<compile_context>
chip_gen: v6e
topology: v6e:2x2x1
jax: 0.10.0
libtpu: 0.0.40
codegen_flags: <defaults>
</compile_context>

<pallas_src>
import functools

import jax
import jax.numpy as jnp
import numpy as np
from jax.experimental import pallas as pl
from jax.experimental.pallas import tpu as pltpu


# ----------------------------------------------------------------------------
# Kernel A: 3x3 'same' conv as a single bf16 im2col matmul on the MXU,
# plus per-image partial BatchNorm statistics (sum, sum of squares).
# Output is channel-major (Cout, H*W) bf16 -> lane-dense store.
# ----------------------------------------------------------------------------
def conv_stats_kernel(x_ref, w_ref, y_ref, stats_ref):
    # x_ref:     (H+2, W+2, Cin)  f32   'same'-padded input image
    # w_ref:     (9*Cin, Cout)    bf16  packed 3x3 weights (kh, kw, cin) major
    # y_ref:     (Cout, H*W)      bf16  channel-major conv output (lane-dense)
    # stats_ref: (2, Cout)        f32   per-image [sum; sum-of-squares]
    Hp2, Wp2, Cin = x_ref.shape
    H, W = Hp2 - 2, Wp2 - 2
    K = 3

    # im2col: 9 shifted views concatenated on the channel axis -> ONE matmul
    # (instead of 9 tiny K=Cin matmuls).
    taps = [x_ref[kh:kh + H, kw:kw + W, :]
            for kh in range(K) for kw in range(K)]             # 9 x (H, W, Cin)
    patches = jnp.concatenate(taps, axis=2)                    # (H, W, 9*Cin)
    cols = patches.reshape(H * W, K * K * Cin).astype(jnp.bfloat16)

    acc = jnp.dot(cols, w_ref[...],
                  preferred_element_type=jnp.float32)          # (H*W, Cout) f32

    # Per-image partial BN statistics; reduced over the batch in the wrapper
    # (keeps the batch grid axis fully parallel / megacore friendly).
    s = jnp.sum(acc, axis=0, keepdims=True)                    # (1, Cout)
    sq = jnp.sum(acc * acc, axis=0, keepdims=True)             # (1, Cout)
    stats_ref[...] = jnp.concatenate([s, sq], axis=0)          # (2, Cout)

    # Channel-major, lane-dense bf16 store of the conv intermediate.
    y_ref[...] = acc.T.astype(jnp.bfloat16)                    # (Cout, H*W)


# ----------------------------------------------------------------------------
# Kernel B: BatchNorm affine (scale/shift precomputed in the wrapper) +
# LeakyReLU(0.1) + 2x2 max-pool, all on the lane-dense channel-major layout.
# The pooled result is written at even-w lanes of a (Cout, Hp*W) block; a
# tiny stride-2 slice in the wrapper drops the odd-w lanes.
# ----------------------------------------------------------------------------
def bn_act_pool_kernel(y_ref, scale_ref, shift_ref, o_ref, *, W, Hp,
                       slope=0.1):
    # y_ref:     (Cout, H*W)   bf16  conv output, lane index p = h*W + w
    # scale_ref: (Cout, 1)     f32   gamma * rsqrt(var + eps)
    # shift_ref: (Cout, 1)     f32   beta - mean * scale
    # o_ref:     (Cout, Hp*W)  f32   pooled values (valid at even-w lanes)
    z = y_ref[...].astype(jnp.float32) * scale_ref[...] + shift_ref[...]
    z = jnp.where(z >= 0, z, slope * z)                        # LeakyReLU(0.1)

    # Height pooling + even-row selection via static W-wide lane chunks.
    z_eh = jnp.concatenate(
        [z[:, (2 * hp) * W:(2 * hp + 1) * W] for hp in range(Hp)], axis=1)
    z_oh = jnp.concatenate(
        [z[:, (2 * hp + 1) * W:(2 * hp + 2) * W] for hp in range(Hp)], axis=1)
    mh = jnp.maximum(z_eh, z_oh)                               # (Cout, Hp*W)

    # Width pooling: neighbour max; valid at even-w lanes (odd lanes dropped
    # by the wrapper's stride-2 slice at pooled size).
    mh_next = jnp.concatenate([mh[:, 1:], mh[:, :1]], axis=1)  # mh[p+1]
    o_ref[...] = jnp.maximum(mh, mh_next)


# ----------------------------------------------------------------------------
# Wrapper
# ----------------------------------------------------------------------------
def conv_dn_forward(x_nchw, w_oihw, bias, gamma, beta, eps=1e-5, slope=0.1):
    N, Cin, H, W = x_nchw.shape
    Cout = w_oihw.shape[0]
    Hp, Wp = H // 2, W // 2

    # Glue: NCHW -> NHWC, 'same' padding, weight repack to (9*Cin, Cout) bf16.
    x = jnp.transpose(x_nchw, (0, 2, 3, 1)).astype(jnp.float32)
    xpad = jnp.pad(x, ((0, 0), (1, 1), (1, 1), (0, 0)))
    wmat = (jnp.transpose(w_oihw, (2, 3, 1, 0))
            .reshape(9 * Cin, Cout).astype(jnp.bfloat16))
    # Conv bias is intentionally unused: training-mode BatchNorm subtracts the
    # batch mean, so a per-channel bias cancels exactly in the final output.
    del bias

    conv_cm, stats = pl.pallas_call(
        conv_stats_kernel,
        out_shape=(jax.ShapeDtypeStruct((N, Cout, H * W), jnp.bfloat16),
                   jax.ShapeDtypeStruct((N, 2, Cout), jnp.float32)),
        grid=(N,),
        in_specs=[
            pl.BlockSpec((pl.Squeezed(), H + 2, W + 2, Cin),
                         lambda i: (i, 0, 0, 0)),
            pl.BlockSpec((9 * Cin, Cout), lambda i: (0, 0)),
        ],
        out_specs=[
            pl.BlockSpec((pl.Squeezed(), Cout, H * W), lambda i: (i, 0, 0)),
            pl.BlockSpec((pl.Squeezed(), 2, Cout), lambda i: (i, 0, 0)),
        ],
        compiler_params=pltpu.CompilerParams(
            dimension_semantics=("parallel",)),
    )(xpad, wmat)
    # TODO(synk): at production H/W, add a row-strip grid axis (with halo) and
    # set vmem_limit_bytes per-generation so blocks fit v7x's 64 MiB VMEM.

    # BN scale/shift computed once (hoisted out of the per-image kernel body).
    totals = stats.sum(axis=0)                                 # (2, Cout)
    cnt = float(N * H * W)
    mean = totals[0] / cnt
    var = totals[1] / cnt - mean * mean                        # biased var
    inv = jax.lax.rsqrt(var + eps)
    g32 = gamma.astype(jnp.float32)
    scale = (g32 * inv).reshape(Cout, 1)
    shift = (beta.astype(jnp.float32) - mean * g32 * inv).reshape(Cout, 1)

    pooled_w = pl.pallas_call(
        functools.partial(bn_act_pool_kernel, W=W, Hp=Hp, slope=slope),
        out_shape=jax.ShapeDtypeStruct((N, Cout, Hp * W), jnp.float32),
        grid=(N,),
        in_specs=[
            pl.BlockSpec((pl.Squeezed(), Cout, H * W), lambda i: (i, 0, 0)),
            pl.BlockSpec((Cout, 1), lambda i: (0, 0)),
            pl.BlockSpec((Cout, 1), lambda i: (0, 0)),
        ],
        out_specs=pl.BlockSpec((pl.Squeezed(), Cout, Hp * W),
                               lambda i: (i, 0, 0)),
        compiler_params=pltpu.CompilerParams(
            dimension_semantics=("parallel",)),
    )(conv_cm, scale, shift)

    # Free (layout-preserving) reshape + tiny stride-2 slice at pooled size
    # finishes the width half of the 2x2 pooling; result is already NCHW.
    # TODO(synk): fold this stride-2 lane selection into kernel B's store.
    out = pooled_w.reshape(N, Cout, Hp, W)[:, :, :, 0::2]      # (N, C, Hp, Wp)
    return out


# ----------------------------------------------------------------------------
# Pure-JAX reference (for correctness check)
# ----------------------------------------------------------------------------
def conv_dn_reference(x, w, b, gamma, beta, eps=1e-5, slope=0.1):
    y = jax.lax.conv_general_dilated(
        x, w, window_strides=(1, 1), padding=((1, 1), (1, 1)),
        dimension_numbers=('NCHW', 'OIHW', 'NCHW'))
    y = y + b[None, :, None, None]
    mean = y.mean(axis=(0, 2, 3))
    var = y.var(axis=(0, 2, 3))                                # biased
    yn = (y - mean[None, :, None, None]) * jax.lax.rsqrt(
        var + eps)[None, :, None, None]
    yn = yn * gamma[None, :, None, None] + beta[None, :, None, None]
    yl = jnp.where(yn >= 0, yn, slope * yn)
    N, C, H, W = yl.shape
    return yl.reshape(N, C, H // 2, 2, W // 2, 2).max(axis=(3, 5))


if __name__ == "__main__":
    N, in_ch, out_ch, H, W = 2, 4, 8, 16, 16

    key = jax.random.PRNGKey(0)
    kx, kw, kb, kg, kbe = jax.random.split(key, 5)
    x = jax.random.normal(kx, (N, in_ch, H, W), dtype=jnp.float32)
    w = 0.1 * jax.random.normal(kw, (out_ch, in_ch, 3, 3), dtype=jnp.float32)
    bias = 0.1 * jax.random.normal(kb, (out_ch,), dtype=jnp.float32)
    gamma = 1.0 + 0.1 * jax.random.normal(kg, (out_ch,), dtype=jnp.float32)
    beta = 0.1 * jax.random.normal(kbe, (out_ch,), dtype=jnp.float32)

    out = jax.block_until_ready(
        jax.jit(conv_dn_forward)(x, w, bias, gamma, beta))
    ref = jax.block_until_ready(conv_dn_reference(x, w, bias, gamma, beta))

    assert out.shape == (N, out_ch, H // 2, W // 2), out.shape
    # bf16 matmul inputs + bf16 conv intermediate -> compare at bf16-level
    # tolerance (observed errors ~0.3-0.5%, well under 5e-2).
    assert np.allclose(np.asarray(out), np.asarray(ref), rtol=5e-2, atol=5e-2)
    print("KERNEL_OK")
</pallas_src>

<mosaic_0001>
module attributes {stable_mosaic.version = 11 : i64} {
  func.func @conv_stats_kernel(%arg0: i32, %arg1: memref<1x18x18x4xf32, #tpu.memory_space<vmem>>, %arg2: memref<36x8xbf16, #tpu.memory_space<vmem>>, %arg3: memref<1x8x256xbf16, #tpu.memory_space<vmem>>, %arg4: memref<1x2x8xf32, #tpu.memory_space<vmem>>) attributes {dimension_semantics = [#tpu.dimension_semantics<parallel>], iteration_bounds = array<i64: 2>, scalar_prefetch = 0 : i64, scratch_operands = 0 : i64, tpu.core_type = #tpu.core_type<tc>, window_params = [{transform_indices = @transform_0, window_bounds = array<i64: 1, 18, 18, 4>}, {pipeline_mode = #tpu.pipeline_mode<synchronous>, transform_indices = @transform_1, window_bounds = array<i64: 36, 8>}, {transform_indices = @transform_2, window_bounds = array<i64: 1, 8, 256>}, {transform_indices = @transform_3, window_bounds = array<i64: 1, 2, 8>}]} {
    %c0 = arith.constant 0 : index
    %c0_0 = arith.constant 0 : index
    %c0_1 = arith.constant 0 : index
    %c0_2 = arith.constant 0 : index
    %0 = vector.load %arg1[%c0, %c0_0, %c0_1, %c0_2] : memref<1x18x18x4xf32, #tpu.memory_space<vmem>>, vector<1x16x16x4xf32>
    %1 = vector.shape_cast %0 : vector<1x16x16x4xf32> to vector<16x16x4xf32>
    %c0_3 = arith.constant 0 : index
    %c0_4 = arith.constant 0 : index
    %c1 = arith.constant 1 : index
    %c0_5 = arith.constant 0 : index
    %2 = vector.load %arg1[%c0_3, %c0_4, %c1, %c0_5] : memref<1x18x18x4xf32, #tpu.memory_space<vmem>>, vector<1x16x16x4xf32>
    %3 = vector.shape_cast %2 : vector<1x16x16x4xf32> to vector<16x16x4xf32>
    %c0_6 = arith.constant 0 : index
    %c0_7 = arith.constant 0 : index
    %c2 = arith.constant 2 : index
    %c0_8 = arith.constant 0 : index
    %4 = vector.load %arg1[%c0_6, %c0_7, %c2, %c0_8] : memref<1x18x18x4xf32, #tpu.memory_space<vmem>>, vector<1x16x16x4xf32>
    %5 = vector.shape_cast %4 : vector<1x16x16x4xf32> to vector<16x16x4xf32>
    %c0_9 = arith.constant 0 : index
    %c1_10 = arith.constant 1 : index
    %c0_11 = arith.constant 0 : index
    %c0_12 = arith.constant 0 : index
    %6 = vector.load %arg1[%c0_9, %c1_10, %c0_11, %c0_12] : memref<1x18x18x4xf32, #tpu.memory_space<vmem>>, vector<1x16x16x4xf32>
    %7 = vector.shape_cast %6 : vector<1x16x16x4xf32> to vector<16x16x4xf32>
    %c0_13 = arith.constant 0 : index
    %c1_14 = arith.constant 1 : index
    %c1_15 = arith.constant 1 : index
    %c0_16 = arith.constant 0 : index
    %8 = vector.load %arg1[%c0_13, %c1_14, %c1_15, %c0_16] : memref<1x18x18x4xf32, #tpu.memory_space<vmem>>, vector<1x16x16x4xf32>
    %9 = vector.shape_cast %8 : vector<1x16x16x4xf32> to vector<16x16x4xf32>
    %c0_17 = arith.constant 0 : index
    %c1_18 = arith.constant 1 : index
    %c2_19 = arith.constant 2 : index
    %c0_20 = arith.constant 0 : index
    %10 = vector.load %arg1[%c0_17, %c1_18, %c2_19, %c0_20] : memref<1x18x18x4xf32, #tpu.memory_space<vmem>>, vector<1x16x16x4xf32>
    %11 = vector.shape_cast %10 : vector<1x16x16x4xf32> to vector<16x16x4xf32>
    %c0_21 = arith.constant 0 : index
    %c2_22 = arith.constant 2 : index
    %c0_23 = arith.constant 0 : index
    %c0_24 = arith.constant 0 : index
    %12 = vector.load %arg1[%c0_21, %c2_22, %c0_23, %c0_24] : memref<1x18x18x4xf32, #tpu.memory_space<vmem>>, vector<1x16x16x4xf32>
    %13 = vector.shape_cast %12 : vector<1x16x16x4xf32> to vector<16x16x4xf32>
    %c0_25 = arith.constant 0 : index
    %c2_26 = arith.constant 2 : index
    %c1_27 = arith.constant 1 : index
    %c0_28 = arith.constant 0 : index
    %14 = vector.load %arg1[%c0_25, %c2_26, %c1_27, %c0_28] : memref<1x18x18x4xf32, #tpu.memory_space<vmem>>, vector<1x16x16x4xf32>
    %15 = vector.shape_cast %14 : vector<1x16x16x4xf32> to vector<16x16x4xf32>
    %c0_29 = arith.constant 0 : index
    %c2_30 = arith.constant 2 : index
    %c2_31 = arith.constant 2 : index
    %c0_32 = arith.constant 0 : index
    %16 = vector.load %arg1[%c0_29, %c2_30, %c2_31, %c0_32] : memref<1x18x18x4xf32, #tpu.memory_space<vmem>>, vector<1x16x16x4xf32>
    %17 = vector.shape_cast %16 : vector<1x16x16x4xf32> to vector<16x16x4xf32>
    %18 = tpu.concatenate %1, %3, %5, %7, %9, %11, %13, %15, %17 in 2 : vector<16x16x4xf32>, vector<16x16x4xf32>, vector<16x16x4xf32>, vector<16x16x4xf32>, vector<16x16x4xf32>, vector<16x16x4xf32>, vector<16x16x4xf32>, vector<16x16x4xf32>, vector<16x16x4xf32> -> vector<16x16x36xf32>
    %19 = vector.shape_cast %18 : vector<16x16x36xf32> to vector<256x36xf32>
    %20 = arith.truncf %19 : vector<256x36xf32> to vector<256x36xbf16>
    %c0_33 = arith.constant 0 : index
    %c0_34 = arith.constant 0 : index
    %21 = vector.load %arg2[%c0_33, %c0_34] : memref<36x8xbf16, #tpu.memory_space<vmem>>, vector<36x8xbf16>
    %cst = arith.constant dense<0.000000e+00> : vector<256x8xf32>
    %22 = tpu.matmul %20, %21, %cst {dimension_numbers = #tpu.dot_dimension_numbers<[1], [0], [0], [1], [0, 0, 1, 1], [], []>} : vector<256x36xbf16>, vector<36x8xbf16>, vector<256x8xf32> -> vector<256x8xf32>
    %cst_35 = arith.constant dense<0.000000e+00> : vector<8xf32>
    %23 = vector.multi_reduction <add>, %22, %cst_35 [0] : vector<256x8xf32> to vector<8xf32>
    %24 = vector.shape_cast %23 : vector<8xf32> to vector<1x8xf32>
    %25 = arith.mulf %22, %22 : vector<256x8xf32>
    %cst_36 = arith.constant dense<0.000000e+00> : vector<8xf32>
    %26 = vector.multi_reduction <add>, %25, %cst_36 [0] : vector<256x8xf32> to vector<8xf32>
    %27 = vector.shape_cast %26 : vector<8xf32> to vector<1x8xf32>
    %28 = tpu.concatenate %24, %27 in 0 : vector<1x8xf32>, vector<1x8xf32> -> vector<2x8xf32>
    %c0_37 = arith.constant 0 : index
    %c0_38 = arith.constant 0 : index
    %c0_39 = arith.constant 0 : index
    %29 = vector.load %arg4[%c0_37, %c0_38, %c0_39] : memref<1x2x8xf32, #tpu.memory_space<vmem>>, vector<1x2x8xf32>
    %30 = vector.shape_cast %29 : vector<1x2x8xf32> to vector<2x8xf32>
    %31 = vector.shape_cast %28 : vector<2x8xf32> to vector<1x2x8xf32>
    tpu.vector_store %arg4[%c0_37, %c0_38, %c0_39], %31 {strides = array<i32>} : memref<1x2x8xf32, #tpu.memory_space<vmem>>, vector<1x2x8xf32>,
    %32 = tpu.transpose %22, [1, 0] : vector<256x8xf32> -> vector<8x256xf32>
    %33 = arith.truncf %32 : vector<8x256xf32> to vector<8x256xbf16>
    %c0_40 = arith.constant 0 : index
    %c0_41 = arith.constant 0 : index
    %c0_42 = arith.constant 0 : index
    %34 = vector.load %arg3[%c0_40, %c0_41, %c0_42] : memref<1x8x256xbf16, #tpu.memory_space<vmem>>, vector<1x8x256xbf16>
    %35 = vector.shape_cast %34 : vector<1x8x256xbf16> to vector<8x256xbf16>
    %36 = vector.shape_cast %33 : vector<8x256xbf16> to vector<1x8x256xbf16>
    tpu.vector_store %arg3[%c0_40, %c0_41, %c0_42], %36 {strides = array<i32>} : memref<1x8x256xbf16, #tpu.memory_space<vmem>>, vector<1x8x256xbf16>,
    return
  }
  func.func @transform_0(%arg0: i32) -> (i32, i32, i32, i32) {
    %c0_i32 = arith.constant 0 : i32
    %c0_i32_0 = arith.constant 0 : i32
    %c0_i32_1 = arith.constant 0 : i32
    %c0_i32_2 = arith.constant 0 : i32
    return %arg0, %c0_i32, %c0_i32_0, %c0_i32_1 : i32, i32, i32, i32
  }
  func.func @transform_1(%arg0: i32) -> (i32, i32) {
    %c0_i32 = arith.constant 0 : i32
    %c0_i32_0 = arith.constant 0 : i32
    %c0_i32_1 = arith.constant 0 : i32
    return %c0_i32, %c0_i32_0 : i32, i32
  }
  func.func @transform_2(%arg0: i32) -> (i32, i32, i32) {
    %c0_i32 = arith.constant 0 : i32
    %c0_i32_0 = arith.constant 0 : i32
    %c0_i32_1 = arith.constant 0 : i32
    return %arg0, %c0_i32, %c0_i32_0 : i32, i32, i32
  }
  func.func @transform_3(%arg0: i32) -> (i32, i32, i32) {
    %c0_i32 = arith.constant 0 : i32
    %c0_i32_0 = arith.constant 0 : i32
    %c0_i32_1 = arith.constant 0 : i32
    return %arg0, %c0_i32, %c0_i32_0 : i32, i32, i32
  }
}

module attributes {stable_mosaic.version = 11 : i64} {
  func.func @bn_act_pool_kernel(%arg0: i32, %arg1: memref<1x8x256xbf16, #tpu.memory_space<vmem>>, %arg2: memref<8x1xf32, #tpu.memory_space<vmem>>, %arg3: memref<8x1xf32, #tpu.memory_space<vmem>>, %arg4: memref<1x8x128xf32, #tpu.memory_space<vmem>>) attributes {dimension_semantics = [#tpu.dimension_semantics<parallel>], iteration_bounds = array<i64: 2>, scalar_prefetch = 0 : i64, scratch_operands = 0 : i64, tpu.core_type = #tpu.core_type<tc>, window_params = [{transform_indices = @transform_0, window_bounds = array<i64: 1, 8, 256>}, {pipeline_mode = #tpu.pipeline_mode<synchronous>, transform_indices = @transform_1, window_bounds = array<i64: 8, 1>}, {pipeline_mode = #tpu.pipeline_mode<synchronous>, transform_indices = @transform_2, window_bounds = array<i64: 8, 1>}, {transform_indices = @transform_3, window_bounds = array<i64: 1, 8, 128>}]} {
    %c0 = arith.constant 0 : index
    %c0_0 = arith.constant 0 : index
    %c0_1 = arith.constant 0 : index
    %0 = vector.load %arg1[%c0, %c0_0, %c0_1] : memref<1x8x256xbf16, #tpu.memory_space<vmem>>, vector<1x8x256xbf16>
    %1 = vector.shape_cast %0 : vector<1x8x256xbf16> to vector<8x256xbf16>
    %2 = arith.extf %1 : vector<8x256xbf16> to vector<8x256xf32>
    %c0_2 = arith.constant 0 : index
    %c0_3 = arith.constant 0 : index
    %3 = vector.load %arg2[%c0_2, %c0_3] : memref<8x1xf32, #tpu.memory_space<vmem>>, vector<8x1xf32>
    %4 = vector.broadcast %3 : vector<8x1xf32> to vector<8x256xf32>
    %5 = arith.mulf %2, %4 : vector<8x256xf32>
    %c0_4 = arith.constant 0 : index
    %c0_5 = arith.constant 0 : index
    %6 = vector.load %arg3[%c0_4, %c0_5] : memref<8x1xf32, #tpu.memory_space<vmem>>, vector<8x1xf32>
    %7 = vector.broadcast %6 : vector<8x1xf32> to vector<8x256xf32>
    %8 = arith.addf %5, %7 : vector<8x256xf32>
    %cst = arith.constant 0.000000e+00 : f32
    %9 = vector.broadcast %cst : f32 to vector<8x256xf32>
    %10 = arith.cmpf oge, %8, %9 : vector<8x256xf32>
    %cst_6 = arith.constant 1.000000e-01 : f32
    %11 = vector.broadcast %cst_6 : f32 to vector<8x256xf32>
    %12 = arith.mulf %11, %8 : vector<8x256xf32>
    %13 = arith.select %10, %8, %12 : vector<8x256xi1>, vector<8x256xf32>
    %14 = vector.extract_strided_slice %13 {offsets = [0, 0], sizes = [8, 16], strides = [1, 1]} : vector<8x256xf32> to vector<8x16xf32>
    %15 = vector.extract_strided_slice %13 {offsets = [0, 32], sizes = [8, 16], strides = [1, 1]} : vector<8x256xf32> to vector<8x16xf32>
    %16 = vector.extract_strided_slice %13 {offsets = [0, 64], sizes = [8, 16], strides = [1, 1]} : vector<8x256xf32> to vector<8x16xf32>
    %17 = vector.extract_strided_slice %13 {offsets = [0, 96], sizes = [8, 16], strides = [1, 1]} : vector<8x256xf32> to vector<8x16xf32>
    %18 = vector.extract_strided_slice %13 {offsets = [0, 128], sizes = [8, 16], strides = [1, 1]} : vector<8x256xf32> to vector<8x16xf32>
    %19 = vector.extract_strided_slice %13 {offsets = [0, 160], sizes = [8, 16], strides = [1, 1]} : vector<8x256xf32> to vector<8x16xf32>
    %20 = vector.extract_strided_slice %13 {offsets = [0, 192], sizes = [8, 16], strides = [1, 1]} : vector<8x256xf32> to vector<8x16xf32>
    %21 = vector.extract_strided_slice %13 {offsets = [0, 224], sizes = [8, 16], strides = [1, 1]} : vector<8x256xf32> to vector<8x16xf32>
    %22 = tpu.concatenate %14, %15, %16, %17, %18, %19, %20, %21 in 1 : vector<8x16xf32>, vector<8x16xf32>, vector<8x16xf32>, vector<8x16xf32>, vector<8x16xf32>, vector<8x16xf32>, vector<8x16xf32>, vector<8x16xf32> -> vector<8x128xf32>
    %23 = vector.extract_strided_slice %13 {offsets = [0, 16], sizes = [8, 16], strides = [1, 1]} : vector<8x256xf32> to vector<8x16xf32>
    %24 = vector.extract_strided_slice %13 {offsets = [0, 48], sizes = [8, 16], strides = [1, 1]} : vector<8x256xf32> to vector<8x16xf32>
    %25 = vector.extract_strided_slice %13 {offsets = [0, 80], sizes = [8, 16], strides = [1, 1]} : vector<8x256xf32> to vector<8x16xf32>
    %26 = vector.extract_strided_slice %13 {offsets = [0, 112], sizes = [8, 16], strides = [1, 1]} : vector<8x256xf32> to vector<8x16xf32>
    %27 = vector.extract_strided_slice %13 {offsets = [0, 144], sizes = [8, 16], strides = [1, 1]} : vector<8x256xf32> to vector<8x16xf32>
    %28 = vector.extract_strided_slice %13 {offsets = [0, 176], sizes = [8, 16], strides = [1, 1]} : vector<8x256xf32> to vector<8x16xf32>
    %29 = vector.extract_strided_slice %13 {offsets = [0, 208], sizes = [8, 16], strides = [1, 1]} : vector<8x256xf32> to vector<8x16xf32>
    %30 = vector.extract_strided_slice %13 {offsets = [0, 240], sizes = [8, 16], strides = [1, 1]} : vector<8x256xf32> to vector<8x16xf32>
    %31 = tpu.concatenate %23, %24, %25, %26, %27, %28, %29, %30 in 1 : vector<8x16xf32>, vector<8x16xf32>, vector<8x16xf32>, vector<8x16xf32>, vector<8x16xf32>, vector<8x16xf32>, vector<8x16xf32>, vector<8x16xf32> -> vector<8x128xf32>
    %32 = arith.maximumf %22, %31 : vector<8x128xf32>
    %33 = vector.extract_strided_slice %32 {offsets = [0, 1], sizes = [8, 127], strides = [1, 1]} : vector<8x128xf32> to vector<8x127xf32>
    %34 = vector.extract_strided_slice %32 {offsets = [0, 0], sizes = [8, 1], strides = [1, 1]} : vector<8x128xf32> to vector<8x1xf32>
    %35 = tpu.concatenate %33, %34 in 1 : vector<8x127xf32>, vector<8x1xf32> -> vector<8x128xf32>
    %36 = arith.maximumf %32, %35 : vector<8x128xf32>
    %c0_7 = arith.constant 0 : index
    %c0_8 = arith.constant 0 : index
    %c0_9 = arith.constant 0 : index
    %37 = vector.load %arg4[%c0_7, %c0_8, %c0_9] : memref<1x8x128xf32, #tpu.memory_space<vmem>>, vector<1x8x128xf32>
    %38 = vector.shape_cast %37 : vector<1x8x128xf32> to vector<8x128xf32>
    %39 = vector.shape_cast %36 : vector<8x128xf32> to vector<1x8x128xf32>
    tpu.vector_store %arg4[%c0_7, %c0_8, %c0_9], %39 {strides = array<i32>} : memref<1x8x128xf32, #tpu.memory_space<vmem>>, vector<1x8x128xf32>,
    return
  }
  func.func @transform_0(%arg0: i32) -> (i32, i32, i32) {
    %c0_i32 = arith.constant 0 : i32
    %c0_i32_0 = arith.constant 0 : i32
    %c0_i32_1 = arith.constant 0 : i32
    return %arg0, %c0_i32, %c0_i32_0 : i32, i32, i32
  }
  func.func @transform_1(%arg0: i32) -> (i32, i32) {
    %c0_i32 = arith.constant 0 : i32
    %c0_i32_0 = arith.constant 0 : i32
    %c0_i32_1 = arith.constant 0 : i32
    return %c0_i32, %c0_i32_0 : i32, i32
  }
  func.func @transform_2(%arg0: i32) -> (i32, i32) {
    %c0_i32 = arith.constant 0 : i32
    %c0_i32_0 = arith.constant 0 : i32
    %c0_i32_1 = arith.constant 0 : i32
    return %c0_i32, %c0_i32_0 : i32, i32
  }
  func.func @transform_3(%arg0: i32) -> (i32, i32, i32) {
    %c0_i32 = arith.constant 0 : i32
    %c0_i32_0 = arith.constant 0 : i32
    %c0_i32_1 = arith.constant 0 : i32
    return %arg0, %c0_i32, %c0_i32_0 : i32, i32, i32
  }
}

</mosaic_0001>

<bundles_post_ra>
// kernel: conv_dn_forward.3
= control target key start
LH: loop header
LB: loop body
LE: loop exit
PB: predicated region body
PF: predicated region fallthrough
CT: control target
= control target key end

     0   :  { %s367_s12 = smov 0   ;;  %s397_s0 = inlined_call_operand.vmem [shape: bf16[2,8,256], index: 0, kind: input, shape index: {}]   ;;  %s398_s1 = inlined_call_operand.vmem [shape: f32[8,1], index: 1, kind: input, shape index: {}]   ;;  %s399_s2 = inlined_call_operand.vmem [shape: f32[8,1], index: 2, kind: input, shape index: {}]   ;;  %s400_s3 = inlined_call_operand.vmem [shape: f32[2,8,128], index: 3, kind: output, shape index: {}]  }
   0x1 LB: > { %s301_s13 = sadd.s32 4294967295, %s336_s12   ;;  %p305_p0 = scmp.ge.s32.totalorder %s336_s12, 1  ;;  %s336_s12 = sphi %s367_s12, %s13_s12  }
   0x2   : > { %p137_p1 = scmp.lt.s32.totalorder %s336_s12, 3 }
   0x4   : > { %p138_p2 = pnand %p305_p0, %p137_p1 }
   0x5   : > { %p160_p3 = scmp.lt.s32.totalorder (!%p138_p2), %s301_s13, 1  ;;  %s339_s22 = smov (!%p138_p2), 80  }
   0x6   : > { %141 = sbr.rel (%p138_p2) target bundleno = 399 (0x18f), region = 32  ;;  %s340_s23 = smov (!%p138_p2), 112  }
   0x7   : > { %s341_s24 = smov (!%p138_p2), 64   ;;  %s342_s25 = smov (!%p138_p2), 96  }
   0x8   : > { %s343_s26 = smov (!%p138_p2), 32   ;;  %s344_s27 = smov (!%p138_p2), 48  }
   0x9   : > { %s345_s28 = smov (!%p138_p2), 16   ;;  %s346_s29 = smov (!%p138_p2), 127  }
   0xb   : > { %v172_v0 = vld [vmem:[%s398_s1] sm:$0xff]  ;;  %v338_v1 = vmov 0   ;;  %s402_s13 = smov (!%p160_p3, %s301_s13), 1  ;;  %vm217_vm2 = vcmask 130048   ;;  %vm219_vm3 = vcmask 261120   ;;  %vm221_vm4 = vcmask 392192  }
   0xc   : > { %329 = vset.pattern.permute.xlu0 %v338_v1  ;;  %v180_v2 = vld [vmem:[%s399_s2] sm:$0xff]  ;;  %s311_s18 = sshll.u32 %s402_s13, 3  ;;  %vm223_vm5 = vcmask 523264   ;;  %vm225_vm6 = vcmask 654336   ;;  %vm227_vm7 = vcmask 785408   ;;  %vm229_vm8 = vcmask 916480  }
   0xd   : > { %175 = vperm.xlu0 %329, %v172_v0   ;;  %s164_s21 = scalar_lea.vmem %s397_s0, %s311_s18  ;;  %s168_s5 = scalar_lea.vmem %s400_s3, %s311_s18 }
   0xe   : > { %v169_v3 = vld [vmem:[%s164_s21] sm:$0xff] }
   0xf   : > { %v170_v4 = vunpack.c.l.bf16 %v169_v3  ;;  %v171_v5 = vunpack.c.h.bf16 %v169_v3 }
  0x11   : > { %183 = vperm.xlu0 %329, %v180_v2  }
  0x88   : > { %v176_v6 = vpop.permute.xlu0 %175 }
  0x89   : > { %v178_v7 = vmul.f32 %v176_v6, %v170_v4  ;;  %v179_v8 = vmul.f32 %v176_v6, %v171_v5 }
  0x8c   : > { %v184_v9 = vpop.permute.xlu0 %183 }
  0x8d   : > { %v186_v10 = vadd.f32 %v184_v9, %v178_v7  ;;  %v187_v11 = vadd.f32 %v184_v9, %v179_v8 }
  0x8f   : > { %vm188_vm0 = vcmp.ge.f32.partialorder %v186_v10, 0.0  ;;  %v190_v12 = vmul.f32 0.1, %v186_v10  ;;  %v191_v13 = vmul.f32 0.1, %v187_v11  ;;  %vm189_vm1 = vcmp.ge.f32.partialorder %v187_v11, 0.0 }
  0x91   : > { %v192_v14 = vsel %vm188_vm0, %v186_v10, %v190_v12  ;;  %v193_v15 = vsel %vm189_vm1, %v187_v11, %v191_v13 }
  0x92   : > { %201 = vrot.lane.b32.xlu0 %v192_v14, %s339_s22  ;;  %195 = vrot.lane.b32.xlu1 %v192_v14, %s340_s23 }
  0x96   : > { %205 = vrot.lane.b32.xlu0 %v193_v15, %s341_s24  ;;  %198 = vrot.lane.b32.xlu1 %v192_v14, %s342_s25 }
  0x9a   : > { %211 = vrot.lane.b32.xlu0 %v193_v15, %s343_s26  ;;  %231 = vrot.lane.b32.xlu1 %v192_v14, %s341_s24 }
  0x9e   : > { %208 = vrot.lane.b32.xlu1 %v193_v15, %s344_s27 }
  0xa2   : > { %214 = vrot.lane.b32.xlu1 %v193_v15, %s345_s28 }
 0x104   : > { %v196_v16 = vpop.permute.xlu1 %195  ;;  %v202_v17 = vpop.permute.xlu0 %201 }
 0x105   : > { %v218_v19 = vsel %vm217_vm2, %v192_v14, %v196_v16 }
 0x108   : > { %v199_v18 = vpop.permute.xlu1 %198  ;;  %v206_v23 = vpop.permute.xlu0 %205 }
 0x109   : > { %v220_v20 = vsel %vm219_vm3, %v218_v19, %v199_v18  ;;  %v234_v21 = vsel %vm217_vm2, %v196_v16, %v199_v18 }
 0x10a   : > { %v222_v24 = vsel %vm221_vm4, %v220_v20, %v202_v17  ;;  %v235_v25 = vsel %vm219_vm3, %v234_v21, %v202_v17 }
 0x10b   : > { %v224_v27 = vsel %vm223_vm5, %v222_v24, %v206_v23 }
 0x10c   : > { %v232_v22 = vpop.permute.xlu1 %231  ;;  %v212_v31 = vpop.permute.xlu0 %211 }
 0x10d   : > { %v236_v26 = vsel %vm221_vm4, %v235_v25, %v232_v22 }
 0x110   : > { %v209_v28 = vpop.permute.xlu1 %208 }
 0x111   : > { %v226_v29 = vsel %vm225_vm6, %v224_v27, %v209_v28  ;;  %v237_v30 = vsel %vm223_vm5, %v236_v26, %v209_v28 }
 0x112   : > { %v228_v32 = vsel %vm227_vm7, %v226_v29, %v212_v31  ;;  %v238_v33 = vsel %vm225_vm6, %v237_v30, %v212_v31 }
 0x114   : > { %v215_v34 = vpop.permute.xlu1 %214 }
 0x115   : > { %v230_v35 = vsel %vm229_vm8, %v228_v32, %v215_v34  ;;  %v239_v36 = vsel %vm227_vm7, %v238_v33, %v215_v34 }
 0x116   : > { %v240_v37 = vsel %vm229_vm8, %v239_v36, %v193_v15 }
 0x117   : > { %v241_v38 = vmax.f32 %v230_v35, %v240_v37 }
 0x119   : > { %243 = vrot.lane.b32.xlu0 %v241_v38, %s346_s29 }
 0x18b   : > { %v244_v39 = vpop.permute.xlu0 %243 }
 0x18c   : > { %v246_v40 = vmax.f32 %v241_v38, %v244_v39 }
 0x18e   : > { %247 = vst [vmem:[%s168_s5] sm:$0xff] %v246_v40 }
 0x18f PF: > { %s13_s12 = sadd.s32 1, %s336_s12  }
 0x190   : > { %p10_p4 = scmp.ge.s32.totalorder %s13_s12, 4  }
 0x192   :  { %12 = sbr.rel (!%p10_p4) target bundleno = 1 (0x1), region = 62 }

// kernel: conv_dn_forward.2
= control target key start
LH: loop header
LB: loop body
LE: loop exit
PB: predicated region body
PF: predicated region fallthrough
CT: control target
= control target key end

     0   :  { %s3373_s12 = smov 0   ;;  %s4762_s0 = inlined_call_operand.vmem [shape: f32[2,18,18,4], index: 0, kind: input, shape index: {}]   ;;  %s4763_s1 = inlined_call_operand.vmem [shape: bf16[36,8], index: 1, kind: input, shape index: {}]   ;;  %s4764_s2 = inlined_call_operand.vmem [shape: bf16[2,8,256], index: 2, kind: output, shape index: {0}]   ;;  %s4765_s3 = inlined_call_operand.vmem [shape: f32[2,2,8], index: 3, kind: output, shape index: {1}]  }
   0x1 LB: > { %s2344_s13 = sadd.s32 4294967295, %s3343_s12   ;;  %p2348_p0 = scmp.ge.s32.totalorder %s3343_s12, 1  ;;  %s3343_s12 = sphi %s3373_s12, %s14_s12  }
   0x2   : > { %p140_p1 = scmp.lt.s32.totalorder %s3343_s12, 3 }
   0x4   : > { %p141_p2 = pnand %p2348_p0, %p140_p1 }
   0x6   : > { %144 = sbr.rel (%p141_p2) target bundleno = 673 (0x2a1), region = 28 }
   0xb   : > { %p168_p3 = scmp.lt.s32.totalorder %s2344_s13, 1  ;;  %s3345_s18 = smov 4   ;;  %vm1846_vm0 = vcmask 1041408   ;;  %vm1497_vm1 = vcmask 31744   ;;  %vm1530_vm2 = vcmask 64512   ;;  %vm1563_vm3 = vcmask 97280  }
   0xc   : > { %s3346_s19 = smov 8   ;;  %s3347_s20 = smov 12   ;;  %vm1596_vm4 = vcmask 130048   ;;  %vm1629_vm5 = vcmask 162816   ;;  %vm1662_vm6 = vcmask 195584   ;;  %vm1695_vm7 = vcmask 228352  }
   0xd   : > { %s4839_s13 = smov (!%p168_p3, %s2344_s13), 1  ;;  %s3348_s21 = smov 16   ;;  %vm1728_vm8 = vcmask 261120   ;;  %vm1797_vm9 = vcmask 293888   ;;  %vm2181_vm10 = vcmask 1040384   ;;  %vm2183_vm11 = vcmask 58368  }
   0xe   : > { %s2634_s14 = smul.u32 432, %s4839_s13  ;;  %s3349_s26 = smov 20  }
   0xf   : > { %s3350_s29 = smov 24   ;;  %s3351_s30 = smov 28  }
  0x10   : > { %s3387_s17 = scalar_lea.vmem %s4762_s0, %s2634_s14  ;;  %s3352_s4 = smov 32  }
  0x11   : > { %v219_v0 = vld [vmem:[%s3387_s17 + $0x31] sm:$0xff]  ;;  %v220_v1 = vld [vmem:[%s3387_s17 + $0x39] sm:$0xff]  ;;  %v215_v2 = vld [vmem:[%s3387_s17 + $0x1] sm:$0xff]  ;;  %s2352_s5 = sshll.u32 %s4839_s13, 1  ;;  %s2567_s9 = sshll.u32 %s4839_s13, 3 }
  0x12   : > { %v3392_v3 = vpack.i.bf16 %v220_v1, %v219_v0  ;;  %v216_v4 = vld [vmem:[%s3387_s17 + $0x9] sm:$0xff]  ;;  %v222_v6 = vld [vmem:[%s3387_s17 + $0x51] sm:$0xff]  ;;  %v217_v8 = vld [vmem:[%s3387_s17 + $0x19] sm:$0xff]  ;;  %s181_s8 = scalar_lea.vmem %s4765_s3, %s2352_s5  ;;  %s177_s14 = scalar_lea.vmem %s4764_s2, %s2567_s9 }
  0x13   : > { %v221_v5 = vld [vmem:[%s3387_s17 + $0x49] sm:$0xff]  ;;  %v2651_v7 = vpack.i.bf16 %v216_v4, %v215_v2  ;;  %v218_v9 = vld [vmem:[%s3387_s17 + $0x21] sm:$0xff]  ;;  %v225_v12 = vld [vmem:[%s3387_s17 + $0x79] sm:$0xff] }
  0x14   : > { %2662 = vrot.lane.b32.xlu1 %v3392_v3, %s3345_s18  ;;  %v3401_v10 = vpack.i.bf16 %v222_v6, %v221_v5  ;;  %v3404_v11 = vpack.i.bf16 %v218_v9, %v217_v8  ;;  %v226_v13 = vld [vmem:[%s3387_s17 + $0x81] sm:$0xff]  ;;  %v224_v15 = vld [vmem:[%s3387_s17 + $0x69] sm:$0xff]  ;;  %v230_v19 = vld [vmem:[%s3387_s17 + $0xb1] sm:$0xff] }
  0x15   : > { %2652 = vrot.lane.b32.xlu0 %v2651_v7, %s3345_s18  ;;  %v223_v14 = vld [vmem:[%s3387_s17 + $0x61] sm:$0xff]  ;;  %v3412_v16 = vpack.i.bf16 %v226_v13, %v225_v12  ;;  %v229_v18 = vld [vmem:[%s3387_s17 + $0xa9] sm:$0xff]  ;;  %v227_v20 = vld [vmem:[%s3387_s17 + $0x91] sm:$0xff] }
  0x16   : > { %v3416_v17 = vpack.i.bf16 %v224_v15, %v223_v14  ;;  %v228_v21 = vld [vmem:[%s3387_s17 + $0x99] sm:$0xff]  ;;  %v3424_v22 = vpack.i.bf16 %v230_v19, %v229_v18  ;;  %v234_v25 = vld [vmem:[%s3387_s17 + $0xe1] sm:$0xff]  ;;  %v232_v27 = vld [vmem:[%s3387_s17 + $0xc9] sm:$0xff] }
  0x17   : > { %v3428_v23 = vpack.i.bf16 %v228_v21, %v227_v20  ;;  %v233_v24 = vld [vmem:[%s3387_s17 + $0xd9] sm:$0xff]  ;;  %v231_v26 = vld [vmem:[%s3387_s17 + $0xc1] sm:$0xff]  ;;  %v237_v30 = vld [vmem:[%s3387_s17 + $0x109] sm:$0xff] }
  0x18   : > { %2667 = vrot.lane.b32.xlu1 %v3401_v10, %s3345_s18  ;;  %v3436_v28 = vpack.i.bf16 %v234_v25, %v233_v24  ;;  %v3440_v29 = vpack.i.bf16 %v232_v27, %v231_v26  ;;  %v238_v31 = vld [vmem:[%s3387_s17 + $0x111] sm:$0xff]  ;;  %v236_v33 = vld [vmem:[%s3387_s17 + $0xf9] sm:$0xff]  ;;  %v242_v37 = vld [vmem:[%s3387_s17 + $0x141] sm:$0xff] }
  0x19   : > { %2657 = vrot.lane.b32.xlu0 %v3404_v11, %s3345_s18  ;;  %v235_v32 = vld [vmem:[%s3387_s17 + $0xf1] sm:$0xff]  ;;  %v3448_v34 = vpack.i.bf16 %v238_v31, %v237_v30  ;;  %v241_v36 = vld [vmem:[%s3387_s17 + $0x139] sm:$0xff]  ;;  %v239_v38 = vld [vmem:[%s3387_s17 + $0x121] sm:$0xff] }
  0x1a   : > { %v3452_v35 = vpack.i.bf16 %v236_v33, %v235_v32  ;;  %v240_v39 = vld [vmem:[%s3387_s17 + $0x129] sm:$0xff]  ;;  %v3460_v40 = vpack.i.bf16 %v242_v37, %v241_v36  ;;  %v246_v43 = vld [vmem:[%s3387_s17 + $0x171] sm:$0xff]  ;;  %v244_v45 = vld [vmem:[%s3387_s17 + $0x159] sm:$0xff] }
  0x1b   : > { %v3464_v41 = vpack.i.bf16 %v240_v39, %v239_v38  ;;  %v245_v42 = vld [vmem:[%s3387_s17 + $0x169] sm:$0xff]  ;;  %v243_v44 = vld [vmem:[%s3387_s17 + $0x151] sm:$0xff]  ;;  %v249_v48 = vld [vmem:[%s3387_s17 + $0x1a] sm:$0xff] }
  0x1c   : > { %2677 = vrot.lane.b32.xlu1 %v3412_v16, %s3345_s18  ;;  %v2726_v46 = vpack.i.bf16 %v246_v43, %v245_v42  ;;  %v3474_v47 = vpack.i.bf16 %v244_v45, %v243_v44  ;;  %v250_v49 = vld [vmem:[%s3387_s17 + $0x22] sm:$0xff]  ;;  %v248_v51 = vld [vmem:[%s3387_s17 + $0xa] sm:$0xff]  ;;  %v254_v55 = vld [vmem:[%s3387_s17 + $0x52] sm:$0xff] }
  0x1d   : > { %2672 = vrot.lane.b32.xlu0 %v3416_v17, %s3345_s18  ;;  %v247_v50 = vld [vmem:[%s3387_s17 + $0x2] sm:$0xff]  ;;  %v3481_v52 = vpack.i.bf16 %v250_v49, %v249_v48  ;;  %v253_v54 = vld [vmem:[%s3387_s17 + $0x4a] sm:$0xff]  ;;  %v251_v56 = vld [vmem:[%s3387_s17 + $0x32] sm:$0xff] }
  0x1e   : > { %v2731_v53 = vpack.i.bf16 %v248_v51, %v247_v50  ;;  %v252_v57 = vld [vmem:[%s3387_s17 + $0x3a] sm:$0xff]  ;;  %v3491_v58 = vpack.i.bf16 %v254_v55, %v253_v54  ;;  %v258_v61 = vld [vmem:[%s3387_s17 + $0x82] sm:$0xff]  ;;  %v256_v63 = vld [vmem:[%s3387_s17 + $0x6a] sm:$0xff] }
  0x1f   : > { %v3494_v59 = vpack.i.bf16 %v252_v57, %v251_v56  ;;  %v257_v60 = vld [vmem:[%s3387_s17 + $0x7a] sm:$0xff]  ;;  %v255_v62 = vld [vmem:[%s3387_s17 + $0x62] sm:$0xff]  ;;  %v261_v2 = vld [vmem:[%s3387_s17 + $0xaa] sm:$0xff] }
  0x20   : > { %2687 = vrot.lane.b32.xlu1 %v3424_v22, %s3345_s18  ;;  %v3502_v0 = vpack.i.bf16 %v258_v61, %v257_v60  ;;  %v3506_v1 = vpack.i.bf16 %v256_v63, %v255_v62  ;;  %v262_v4 = vld [vmem:[%s3387_s17 + $0xb2] sm:$0xff]  ;;  %v260_v6 = vld [vmem:[%s3387_s17 + $0x9a] sm:$0xff]  ;;  %v266_v12 = vld [vmem:[%s3387_s17 + $0xe2] sm:$0xff] }
  0x21   : > { %2682 = vrot.lane.b32.xlu0 %v3428_v23, %s3345_s18  ;;  %v259_v5 = vld [vmem:[%s3387_s17 + $0x92] sm:$0xff]  ;;  %v3514_v7 = vpack.i.bf16 %v262_v4, %v261_v2  ;;  %v265_v9 = vld [vmem:[%s3387_s17 + $0xda] sm:$0xff]  ;;  %v263_v13 = vld [vmem:[%s3387_s17 + $0xc2] sm:$0xff] }
  0x22   : > { %v3518_v8 = vpack.i.bf16 %v260_v6, %v259_v5  ;;  %v264_v14 = vld [vmem:[%s3387_s17 + $0xca] sm:$0xff]  ;;  %v3526_v15 = vpack.i.bf16 %v266_v12, %v265_v9  ;;  %v270_v20 = vld [vmem:[%s3387_s17 + $0x112] sm:$0xff]  ;;  %v268_v24 = vld [vmem:[%s3387_s17 + $0xfa] sm:$0xff] }
  0x23   : > { %v2771_v18 = vpack.i.bf16 %v264_v14, %v263_v13  ;;  %v269_v19 = vld [vmem:[%s3387_s17 + $0x10a] sm:$0xff]  ;;  %v267_v21 = vld [vmem:[%s3387_s17 + $0xf2] sm:$0xff]  ;;  %v273_v27 = vld [vmem:[%s3387_s17 + $0x13a] sm:$0xff] }
  0x24   : > { %2697 = vrot.lane.b32.xlu1 %v3436_v28, %s3345_s18  ;;  %v3536_v25 = vpack.i.bf16 %v270_v20, %v269_v19  ;;  %v3539_v26 = vpack.i.bf16 %v268_v24, %v267_v21  ;;  %v274_v30 = vld [vmem:[%s3387_s17 + $0x142] sm:$0xff]  ;;  %v272_v32 = vld [vmem:[%s3387_s17 + $0x12a] sm:$0xff]  ;;  %v278_v38 = vld [vmem:[%s3387_s17 + $0x172] sm:$0xff] }
  0x25   : > { %2692 = vrot.lane.b32.xlu0 %v3440_v29, %s3345_s18  ;;  %v271_v31 = vld [vmem:[%s3387_s17 + $0x122] sm:$0xff]  ;;  %v2796_v33 = vpack.i.bf16 %v274_v30, %v273_v27  ;;  %v277_v37 = vld [vmem:[%s3387_s17 + $0x16a] sm:$0xff]  ;;  %v275_v39 = vld [vmem:[%s3387_s17 + $0x152] sm:$0xff] }
  0x26   : > { %v2791_v36 = vpack.i.bf16 %v272_v32, %v271_v31  ;;  %v276_v42 = vld [vmem:[%s3387_s17 + $0x15a] sm:$0xff]  ;;  %v2806_v43 = vpack.i.bf16 %v278_v38, %v277_v37  ;;  %v2355_v45 = vld [vmem:[%s3387_s17 + $0x30] sm:$0xff]  ;;  %v3573_v54 = vld [vmem:[%s3387_s17 + $0x68] sm:$0xff] }
  0x27   : > { %v2801_v44 = vpack.i.bf16 %v276_v42, %v275_v39  ;;  %v3558_v48 = vld [vmem:[%s3387_s17 + $0x18] sm:$0xff]  ;;  %v3561_v49 = vld [vmem:[%s3387_s17 + $0x20] sm:$0xff]  ;;  %4792 = vst [vmem:[#allocation5_spill] sm:$0xff] %v3573_v54  ;;  %v2357_v55 = vld [vmem:[%s3387_s17 + $0x48] sm:$0xff] }
  0x28   : > { %2707 = vrot.lane.b32.xlu1 %v3448_v34, %s3345_s18  ;;  %4789 = vst [vmem:[#allocation2_spill] sm:$0xff] %v3558_v48  ;;  %4790 = vst [vmem:[#allocation3_spill] sm:$0xff] %v3561_v49  ;;  %v2811_v51 = vpack.i.bf16 %v3561_v49, %v3558_v48  ;;  %v2358_v56 = vld [vmem:[%s3387_s17 + $0x50] sm:$0xff]  ;;  %v3590_v62 = vld [vmem:[%s3387_s17 + $0x98] sm:$0xff] }
  0x29   : > { %2702 = vrot.lane.b32.xlu0 %v3452_v35, %s3345_s18  ;;  %v3584_v60 = vpack.i.bf16 %v2358_v56, %v2357_v55  ;;  %v3587_v61 = vld [vmem:[%s3387_s17 + $0x90] sm:$0xff]  ;;  %v3593_v63 = vld [vmem:[%s3387_s17 + $0x78] sm:$0xff]  ;;  %v3596_v2 = vld [vmem:[%s3387_s17 + $0x80] sm:$0xff] }
  0x2a   : > { %v3602_v4 = vpack.i.bf16 %v3590_v62, %v3587_v61  ;;  %v3608_v5 = vpack.i.bf16 %v3596_v2, %v3593_v63  ;;  %v2367_v6 = vld [vmem:[%s3387_s17 + $0xc0] sm:$0xff]  ;;  %v2368_v9 = vld [vmem:[%s3387_s17 + $0xc8] sm:$0xff]  ;;  %v3616_v13 = vld [vmem:[%s3387_s17 + $0xb0] sm:$0xff] }
  0x2b   : > { %v3613_v12 = vld [vmem:[%s3387_s17 + $0xa8] sm:$0xff]  ;;  %v3620_v14 = vpack.i.bf16 %v2368_v9, %v2367_v6  ;;  %v3629_v19 = vld [vmem:[%s3387_s17 + $0xf0] sm:$0xff]  ;;  %v3632_v20 = vld [vmem:[%s3387_s17 + $0xf8] sm:$0xff] }
  0x2c   : > { %2717 = vrot.lane.b32.xlu1 %v3460_v40, %s3345_s18  ;;  %v3635_v21 = vld [vmem:[%s3387_s17 + $0xd8] sm:$0xff]  ;;  %v3638_v24 = vld [vmem:[%s3387_s17 + $0xe0] sm:$0xff]  ;;  %v3644_v27 = vpack.i.bf16 %v3632_v20, %v3629_v19  ;;  %v3654_v32 = vld [vmem:[%s3387_s17 + $0x128] sm:$0xff] }
  0x2d   : > { %2712 = vrot.lane.b32.xlu0 %v3464_v41, %s3345_s18  ;;  %4793 = vst [vmem:[#allocation6_spill] sm:$0xff] %v3635_v21  ;;  %4794 = vst [vmem:[#allocation7_spill] sm:$0xff] %v3638_v24  ;;  %v2851_v30 = vpack.i.bf16 %v3638_v24, %v3635_v21  ;;  %v3651_v31 = vld [vmem:[%s3387_s17 + $0x120] sm:$0xff]  ;;  %v3674_v39 = vld [vmem:[%s3387_s17 + $0x150] sm:$0xff] }
  0x2e   : > { %v3666_v37 = vpack.i.bf16 %v3654_v32, %v3651_v31  ;;  %v3677_v42 = vld [vmem:[%s3387_s17 + $0x158] sm:$0xff]  ;;  %v2384_v55 = vld [vmem:[%s3387_s17 + $0x188] sm:$0xff]  ;;  %v3701_v6 = vld [vmem:[%s3387_s17 + $0x170] sm:$0xff] }
  0x2f   : > { %v3698_v56 = vld [vmem:[%s3387_s17 + $0x168] sm:$0xff] }
  0x30   : > { %2727 = vrot.lane.b32.xlu1 %v2726_v46, %s3345_s18  ;;  %v2356_v46 = vld [vmem:[%s3387_s17 + $0x38] sm:$0xff] }
  0x31   : > { %2722 = vrot.lane.b32.xlu0 %v3474_v47, %s3345_s18  ;;  %v3564_v50 = vpack.i.bf16 %v2356_v46, %v2355_v45  ;;  %v2876_v45 = vpack.i.bf16 %v3677_v42, %v3674_v39 }
  0x34   : > { %2737 = vrot.lane.b32.xlu1 %v3481_v52, %s3346_s19 }
  0x35   : > { %2732 = vrot.lane.b32.xlu0 %v2731_v53, %s3346_s19  ;;  %v3570_v53 = vld [vmem:[%s3387_s17 + $0x60] sm:$0xff] }
  0x36   : > { %4791 = vst [vmem:[#allocation4_spill] sm:$0xff] %v3570_v53  ;;  %v3581_v57 = vpack.i.bf16 %v3573_v54, %v3570_v53 }
  0x38   : > { %2747 = vrot.lane.b32.xlu1 %v3491_v58, %s3346_s19 }
  0x39   : > { %2742 = vrot.lane.b32.xlu0 %v3494_v59, %s3346_s19 }
  0x3c   : > { %2757 = vrot.lane.b32.xlu1 %v3502_v0, %s3346_s19 }
  0x3d   : > { %2752 = vrot.lane.b32.xlu0 %v3506_v1, %s3346_s19 }
  0x40   : > { %2767 = vrot.lane.b32.xlu1 %v3514_v7, %s3346_s19 }
  0x41   : > { %2762 = vrot.lane.b32.xlu0 %v3518_v8, %s3346_s19 }
  0x44   : > { %2777 = vrot.lane.b32.xlu1 %v3526_v15, %s3346_s19 }
  0x45   : > { %2772 = vrot.lane.b32.xlu0 %v2771_v18, %s3346_s19  ;;  %v3626_v18 = vpack.i.bf16 %v3616_v13, %v3613_v12 }
  0x48   : > { %2787 = vrot.lane.b32.xlu1 %v3536_v25, %s3346_s19 }
  0x49   : > { %2782 = vrot.lane.b32.xlu0 %v3539_v26, %s3346_s19 }
  0x4c   : > { %2797 = vrot.lane.b32.xlu1 %v2796_v33, %s3346_s19  ;;  %v3657_v33 = vld [vmem:[%s3387_s17 + $0x108] sm:$0xff] }
  0x4d   : > { %2792 = vrot.lane.b32.xlu0 %v2791_v36, %s3346_s19  ;;  %v3660_v36 = vld [vmem:[%s3387_s17 + $0x110] sm:$0xff] }
  0x4e   : > { %v3671_v38 = vpack.i.bf16 %v3660_v36, %v3657_v33 }
  0x50   : > { %2807 = vrot.lane.b32.xlu1 %v2806_v43, %s3346_s19  ;;  %v3680_v43 = vld [vmem:[%s3387_s17 + $0x138] sm:$0xff] }
  0x51   : > { %2802 = vrot.lane.b32.xlu0 %v2801_v44, %s3346_s19  ;;  %v3683_v44 = vld [vmem:[%s3387_s17 + $0x140] sm:$0xff] }
  0x52   : > { %v3693_v46 = vpack.i.bf16 %v3683_v44, %v3680_v43 }
  0x54   : > { %2817 = vrot.lane.b32.xlu1 %v3564_v50, %s3347_s20 }
  0x55   : > { %2812 = vrot.lane.b32.xlu0 %v2811_v51, %s3347_s20  ;;  %v2383_v51 = vld [vmem:[%s3387_s17 + $0x180] sm:$0xff] }
  0x56   : > { %v2886_v9 = vpack.i.bf16 %v2384_v55, %v2383_v51 }
  0x58   : > { %2827 = vrot.lane.b32.xlu1 %v3581_v57, %s3347_s20 }
  0x59   : > { %2822 = vrot.lane.b32.xlu0 %v3584_v60, %s3347_s20 }
  0x5c   : > { %2837 = vrot.lane.b32.xlu1 %v3602_v4, %s3347_s20 }
  0x5d   : > { %2832 = vrot.lane.b32.xlu0 %v3608_v5, %s3347_s20 }
  0x60   : > { %2847 = vrot.lane.b32.xlu1 %v3620_v14, %s3347_s20 }
  0x61   : > { %2842 = vrot.lane.b32.xlu0 %v3626_v18, %s3347_s20 }
  0x64   : > { %2857 = vrot.lane.b32.xlu1 %v3644_v27, %s3347_s20 }
  0x65   : > { %2852 = vrot.lane.b32.xlu0 %v2851_v30, %s3347_s20  ;;  %v2881_v30 = vpack.i.bf16 %v3701_v6, %v3698_v56 }
  0x68   : > { %2867 = vrot.lane.b32.xlu1 %v3666_v37, %s3347_s20 }
  0x69   : > { %2862 = vrot.lane.b32.xlu0 %v3671_v38, %s3347_s20 }
  0x6c   : > { %2877 = vrot.lane.b32.xlu1 %v2876_v45, %s3347_s20 }
  0x6d   : > { %2872 = vrot.lane.b32.xlu0 %v3693_v46, %s3347_s20 }
  0x70   : > { %2887 = vrot.lane.b32.xlu1 %v2886_v9, %s3347_s20 }
  0x71   : > { %2882 = vrot.lane.b32.xlu0 %v2881_v30, %s3347_s20 }
  0x74   : > { %2897 = vrot.lane.b32.xlu1 %v3392_v3, %s3348_s21 }
  0x75   : > { %2892 = vrot.lane.b32.xlu0 %v3404_v11, %s3348_s21 }
  0x78   : > { %2907 = vrot.lane.b32.xlu1 %v3416_v17, %s3348_s21 }
  0x79   : > { %2902 = vrot.lane.b32.xlu0 %v3401_v10, %s3348_s21 }
  0x7c   : > { %2917 = vrot.lane.b32.xlu1 %v3428_v23, %s3348_s21 }
  0x7d   : > { %2912 = vrot.lane.b32.xlu0 %v3412_v16, %s3348_s21 }
  0x80   : > { %2927 = vrot.lane.b32.xlu1 %v3440_v29, %s3348_s21  ;;  %v3328_v29 = vld [vmem:[%s4763_s1 + $0x10] ss:$0 sps:$4 sm:$0x33]  }
  0x81   : > { %2922 = vrot.lane.b32.xlu0 %v3424_v22, %s3348_s21  ;;  %2632 = vmatprep.subr.msk.bf16.mxu0 %vm1846_vm0, %v3328_v29  ;;  %v1848_v51 = vsel %vm1846_vm0, %v3328_v29, 0 }
  0x82   : > { %2633 = vmatprep.subr.msk.bf16.mxu1 %vm1846_vm0, %v3328_v29  ;;  %2589 = vmatpush3.bf16.msra.mxu0 %v1848_v51 }
  0x83   : > { %2629 = vmatpush3.bf16.msra.mxu1 %v1848_v51 }
  0x84   : > { %2937 = vrot.lane.b32.xlu1 %v3452_v35, %s3348_s21 }
  0x85   : > { %2932 = vrot.lane.b32.xlu0 %v3436_v28, %s3348_s21 }
  0x86   : > { %v3730_v11 = vpop.permute.xlu1 %2662 }
  0x87   : > { %4795 = vst [vmem:[#allocation8_spill] sm:$0xff] %v3730_v11  ;;  %v3732_v45 = vpop.permute.xlu0 %2652  ;;  %v3941_v11 = vld [vmem:[%s3387_s17 + $0xd8] sm:$0xff] }
  0x88   : > { %4796 = vst [vmem:[#allocation9_spill] sm:$0xff] %v3732_v45  ;;  %2947 = vrot.lane.b32.xlu1 %v3464_v41, %s3348_s21  ;;  %v3329_v41 = vld [vmem:[%s4763_s1 + $0x8] sm:$0xff]  }
  0x89   : > { %2942 = vrot.lane.b32.xlu0 %v3448_v34, %s3348_s21  ;;  %2590 = vmatprep.subr.bf16.mxu0 %v3329_v41  ;;  %v3935_v45 = vld [vmem:[%s3387_s17 + $0xc1] sm:$0xff] }
  0x8a   : > { %v3741_v22 = vpop.permute.xlu1 %2667  ;;  %2627 = vmatprep.subr.bf16.mxu1 %v3329_v41  ;;  %2591 = vmatpush3.bf16.msra.mxu0 %v3329_v41 }
  0x8b   : > { %4797 = vst [vmem:[#allocation10_spill] sm:$0xff] %v3741_v22  ;;  %v3743_v28 = vpop.permute.xlu0 %2657  ;;  %2630 = vmatpush3.bf16.msra.mxu1 %v3329_v41 }
  0x8c   : > { %4798 = vst [vmem:[#allocation11_spill] sm:$0xff] %v3743_v28  ;;  %2957 = vrot.lane.b32.xlu1 %v3474_v47, %s3348_s21  ;;  %v3330_v47 = vld [vmem:[%s4763_s1] sm:$0xff]  }
  0x8d   : > { %2952 = vrot.lane.b32.xlu0 %v3460_v40, %s3348_s21  ;;  %2592 = vmatprep.subr.bf16.mxu0 %v3330_v47 }
  0x8e   : > { %v3752_v34 = vpop.permute.xlu1 %2677  ;;  %2628 = vmatprep.subr.bf16.mxu1 %v3330_v47  ;;  %2593 = vmatpush3.bf16.msra.mxu0 %v3330_v47 }
  0x8f   : > { %v3754_v55 = vpop.permute.xlu0 %2672  ;;  %2631 = vmatpush3.bf16.msra.mxu1 %v3330_v47 }
  0x90   : > { %2967 = vrot.lane.b32.xlu1 %v3494_v59, %s3349_s26 }
  0x91   : > { %2962 = vrot.lane.b32.xlu0 %v3481_v52, %s3349_s26 }
  0x92   : > { %v3763_v40 = vpop.permute.xlu1 %2687 }
  0x93   : > { %v3765_v9 = vpop.permute.xlu0 %2682 }
  0x94   : > { %2977 = vrot.lane.b32.xlu1 %v3584_v60, %s3350_s29 }
  0x95   : > { %2972 = vrot.lane.b32.xlu0 %v3564_v50, %s3350_s29 }
  0x96   : > { %v3771_v30 = vpop.permute.xlu1 %2697 }
  0x97   : > { %4799 = vst [vmem:[#allocation12_spill] sm:$0xff] %v3771_v30  ;;  %v3773_v29 = vpop.permute.xlu0 %2692  ;;  %v3948_v30 = vld [vmem:[%s3387_s17 + $0xe0] sm:$0xff] }
  0x98   : > { %4800 = vst [vmem:[#allocation13_spill] sm:$0xff] %v3773_v29  ;;  %2987 = vrot.lane.b32.xlu1 %v3401_v10, %s3351_s30 }
  0x99   : > { %2982 = vrot.lane.b32.xlu0 %v3392_v3, %s3351_s30 }
  0x9a   : > { %v3779_v52 = vpop.permute.xlu1 %2707 }
  0x9b   : > { %v3781_v51 = vpop.permute.xlu0 %2702 }
  0x9c   : > { %2997 = vrot.lane.b32.xlu1 %v3491_v58, %s3352_s4 }
  0x9d   : > { %2992 = vrot.lane.b32.xlu0 %v3494_v59, %s3352_s4 }
  0x9e   : > { %v3787_v50 = vpop.permute.xlu1 %2717 }
  0x9f   : > { %v3789_v60 = vpop.permute.xlu0 %2712 }
  0xa0   : > { %3007 = vrot.lane.b32.xlu1 %v3506_v1, %s3349_s26 }
  0xa1   : > { %3002 = vrot.lane.b32.xlu0 %v3491_v58, %s3349_s26 }
  0xa2   : > { %v2728_v3 = vpop.permute.xlu1 %2727 }
  0xa3   : > { %v3795_v10 = vpop.permute.xlu0 %2722  ;;  %v2729_v49 = vunpack.i.l.bf16 %v2728_v3 }
  0xa4   : > { %3017 = vrot.lane.b32.xlu1 %v3608_v5, %s3350_s29 }
  0xa5   : > { %3012 = vrot.lane.b32.xlu0 %v3581_v57, %s3350_s29 }
  0xa6   : > { %v3801_v59 = vpop.permute.xlu1 %2737 }
  0xa7   : > { %4801 = vst [vmem:[#allocation14_spill] sm:$0xff] %v3801_v59  ;;  %v3803_v41 = vpop.permute.xlu0 %2732 }
  0xa8   : > { %4802 = vst [vmem:[#allocation15_spill] sm:$0xff] %v3803_v41  ;;  %3027 = vrot.lane.b32.xlu1 %v3412_v16, %s3351_s30  ;;  %v2492_v41 = vld [vmem:[%s3387_s17 + $0xb1] sm:$0xff] }
  0xa9   : > { %3022 = vrot.lane.b32.xlu0 %v3416_v17, %s3351_s30 }
  0xaa   : > { %v3809_v58 = vpop.permute.xlu1 %2747 }
  0xab   : > { %4803 = vst [vmem:[#allocation16_spill] sm:$0xff] %v3809_v58  ;;  %v3811_v47 = vpop.permute.xlu0 %2742  ;;  %v2730_v58 = vunpack.i.h.bf16 %v2728_v3  ;;  %v1528_v3 = vsel %vm1497_vm1, %v3698_v56, %v2729_v49  ;;  %v2430_v56 = vld [vmem:[%s3387_s17 + $0xb2] sm:$0xff] }
  0xac   : > { %4804 = vst [vmem:[#allocation17_spill] sm:$0xff] %v3811_v47  ;;  %3037 = vrot.lane.b32.xlu1 %v3502_v0, %s3352_s4  ;;  %v2500_v47 = vld [vmem:[%s3387_s17 + $0x111] sm:$0xff] }
  0xad   : > { %3032 = vrot.lane.b32.xlu0 %v3506_v1, %s3352_s4 }
  0xae   : > { %v3817_v57 = vpop.permute.xlu1 %2757 }
  0xaf   : > { %v3819_v5 = vpop.permute.xlu0 %2752 }
  0xb0   : > { %3047 = vrot.lane.b32.xlu1 %v3502_v0, %s3349_s26 }
  0xb1   : > { %3042 = vrot.lane.b32.xlu0 %v3526_v15, %s3349_s26 }
  0xb2   : > { %v3825_v16 = vpop.permute.xlu1 %2767 }
  0xb3   : > { %v3827_v17 = vpop.permute.xlu0 %2762 }
  0xb4   : > { %3057 = vrot.lane.b32.xlu1 %v3644_v27, %s3350_s29 }
  0xb5   : > { %3052 = vrot.lane.b32.xlu0 %v3539_v26, %s3349_s26 }
  0xb6   : > { %v3833_v1 = vpop.permute.xlu1 %2777 }
  0xb7   : > { %4805 = vst [vmem:[#allocation18_spill] sm:$0xff] %v3833_v1  ;;  %v3835_v29 = vpop.permute.xlu0 %2772 }
  0xb8   : > { %4806 = vst [vmem:[#allocation19_spill] sm:$0xff] %v3835_v29  ;;  %3067 = vrot.lane.b32.xlu1 %v3602_v4, %s3350_s29  ;;  %v2499_v29 = vld [vmem:[%s3387_s17 + $0x109] sm:$0xff] }
  0xb9   : > { %3062 = vrot.lane.b32.xlu0 %v3518_v8, %s3349_s26  ;;  %v3091_v48 = vpack.i.bf16 %v2500_v47, %v2499_v29 }
  0xba   : > { %v3841_v0 = vpop.permute.xlu1 %2787 }
  0xbb   : > { %v3843_v15 = vpop.permute.xlu0 %2782 }
  0xbc   : > { %3077 = vrot.lane.b32.xlu1 %v3452_v35, %s3351_s30  ;;  %v2491_v35 = vld [vmem:[%s3387_s17 + $0xa9] sm:$0xff] }
  0xbd   : > { %3072 = vrot.lane.b32.xlu0 %v3671_v38, %s3350_s29 }
  0xbe   : > { %v3849_v27 = vpop.permute.xlu1 %2797 }
  0xbf   : > { %v3853_v4 = vpop.permute.xlu0 %2792 }
  0xc0   : > { %3087 = vrot.lane.b32.xlu1 %v3428_v23, %s3351_s30  ;;  %v1529_v23 = vsel %vm1497_vm1, %v3701_v6, %v2730_v58  ;;  %v2439_v58 = vld [vmem:[%s3387_s17 + $0x122] sm:$0xff] }
  0xc1   : > { %3082 = vrot.lane.b32.xlu0 %v3626_v18, %s3350_s29 }
  0xc2   : > { %v2808_v22 = vpop.permute.xlu1 %2807 }
  0xc3   : > { %v2810_v38 = vunpack.i.h.bf16 %v2808_v22  ;;  %v2809_v59 = vunpack.i.l.bf16 %v2808_v22  ;;  %v3861_v28 = vpop.permute.xlu0 %2802  ;;  %v3101_v22 = vpack.i.bf16 %v2492_v41, %v2491_v35  ;;  %v2685_v35 = vunpack.i.h.bf16 %v3765_v9 }
  0xc4   : > { %3097 = vrot.lane.b32.xlu1 %v3539_v26, %s3352_s4  ;;  %v2429_v26 = vld [vmem:[%s3387_s17 + $0xaa] sm:$0xff] }
  0xc5   : > { %v3870_v18 = vsel %vm1530_vm2, %v1528_v3, %v2809_v59  ;;  %v3873_v29 = vsel %vm1530_vm2, %v1529_v23, %v2810_v38  ;;  %3092 = vrot.lane.b32.xlu0 %v3091_v48, %s3351_s30  ;;  %v2690_v59 = vunpack.i.h.bf16 %v3763_v40  ;;  %v2689_v48 = vunpack.i.l.bf16 %v3763_v40  ;;  %v2440_v3 = vld [vmem:[%s3387_s17 + $0x12a] sm:$0xff]  ;;  %v2431_v23 = vld [vmem:[%s3387_s17 + $0xc2] sm:$0xff] }
  0xc6   : > { %v3876_v47 = vpop.permute.xlu1 %2817  ;;  %v2684_v38 = vunpack.i.l.bf16 %v3765_v9 }
  0xc7   : > { %4807 = vst [vmem:[#allocation20_spill] sm:$0xff] %v3876_v47  ;;  %v3878_v49 = vpop.permute.xlu0 %2812  ;;  %v1512_v40 = vsel %vm1497_vm1, %v3613_v12, %v2689_v48  ;;  %v2770_v47 = vunpack.i.h.bf16 %v3825_v16  ;;  %v2769_v12 = vunpack.i.l.bf16 %v3825_v16  ;;  %v2765_v48 = vunpack.i.h.bf16 %v3827_v17 }
  0xc8   : > { %4808 = vst [vmem:[#allocation21_spill] sm:$0xff] %v3878_v49  ;;  %3107 = vrot.lane.b32.xlu1 %v3518_v8, %s3352_s4  ;;  %v3126_v8 = vpack.i.bf16 %v2430_v56, %v2429_v26  ;;  %v3909_v49 = vpack.i.bf16 %v2440_v3, %v2439_v58  ;;  %v1510_v26 = vsel %vm1497_vm1, %v3587_v61, %v2684_v38  ;;  %v2764_v61 = vunpack.i.l.bf16 %v3827_v17 }
  0xc9   : > { %3102 = vrot.lane.b32.xlu0 %v3101_v22, %s3351_s30  ;;  %v2432_v22 = vld [vmem:[%s3387_s17 + $0xca] sm:$0xff]  ;;  %v1511_v56 = vsel %vm1497_vm1, %v3590_v62, %v2685_v35  ;;  %v2705_v62 = vunpack.i.h.bf16 %v3781_v51  ;;  %v2704_v16 = vunpack.i.l.bf16 %v3781_v51  ;;  %v2720_v58 = vunpack.i.h.bf16 %v3787_v50 }
  0xca   : > { %v3885_v6 = vpop.permute.xlu1 %2827  ;;  %v2719_v35 = vunpack.i.l.bf16 %v3787_v50  ;;  %v2715_v17 = vunpack.i.h.bf16 %v3789_v60  ;;  %v2714_v3 = vunpack.i.l.bf16 %v3789_v60  ;;  %v3938_v51 = vld [vmem:[%s3387_s17 + $0xc9] sm:$0xff]  ;;  %v1545_v50 = vsel %vm1530_vm2, %v1512_v40, %v2769_v12  ;;  %v3951_v60 = vld [vmem:[%s3387_s17 + $0x139] sm:$0xff] }
  0xcb   : > { %4809 = vst [vmem:[#allocation22_spill] sm:$0xff] %v3885_v6  ;;  %v3889_v41 = vpop.permute.xlu0 %2822  ;;  %v1543_v54 = vsel %vm1530_vm2, %v1510_v26, %v2764_v61  ;;  %v1544_v53 = vsel %vm1530_vm2, %v1511_v56, %v2765_v48  ;;  %v3161_v61 = vpack.i.bf16 %v3948_v30, %v3941_v11  ;;  %v2784_v30 = vunpack.i.l.bf16 %v3843_v15 }
  0xcc   : > { %4810 = vst [vmem:[#allocation23_spill] sm:$0xff] %v3889_v41  ;;  %3117 = vrot.lane.b32.xlu1 %v3514_v7, %s3352_s4  ;;  %v1513_v41 = vsel %vm1497_vm1, %v3616_v13, %v2690_v59  ;;  %v3911_v7 = vpack.i.bf16 %v2432_v22, %v2431_v23  ;;  %v2710_v13 = vunpack.i.h.bf16 %v3779_v52  ;;  %v2709_v59 = vunpack.i.l.bf16 %v3779_v52  ;;  %v2501_v52 = vld [vmem:[%s3387_s17 + $0x121] sm:$0xff] }
  0xcd   : > { %3112 = vrot.lane.b32.xlu0 %v3536_v25, %s3352_s4  ;;  %v1546_v24 = vsel %vm1530_vm2, %v1513_v41, %v2770_v47  ;;  %v2789_v41 = vunpack.i.l.bf16 %v3841_v0  ;;  %v1524_v11 = vsel %vm1497_vm1, %v3680_v43, %v2719_v35 }
  0xce   : > { %v3901_v6 = vpop.permute.xlu1 %2837 }
  0xcf   : > { %v3907_v9 = vpop.permute.xlu0 %2832 }
  0xd0   : > { %4811 = vst [vmem:[#allocation24_spill] sm:$0xff] %v3907_v9  ;;  %3127 = vrot.lane.b32.xlu1 %v3126_v8, %s3349_s26  ;;  %v2502_v8 = vld [vmem:[%s3387_s17 + $0x129] sm:$0xff] }
  0xd1   : > { %3122 = vrot.lane.b32.xlu0 %v3536_v25, %s3349_s26  ;;  %v3156_v48 = vpack.i.bf16 %v2502_v8, %v2501_v52 }
  0xd2   : > { %v2848_v38 = vpop.permute.xlu1 %2847 }
  0xd3   : > { %v2850_v23 = vunpack.i.h.bf16 %v2848_v38  ;;  %v2849_v25 = vunpack.i.l.bf16 %v2848_v38  ;;  %v2843_v22 = vpop.permute.xlu0 %2842  ;;  %v3954_v38 = vld [vmem:[%s3387_s17 + $0x141] sm:$0xff] }
  0xd4   : > { %v2845_v21 = vunpack.i.h.bf16 %v2843_v22  ;;  %v2844_v1 = vunpack.i.l.bf16 %v2843_v22  ;;  %3137 = vrot.lane.b32.xlu1 %v3666_v37, %s3350_s29  ;;  %v2790_v37 = vunpack.i.h.bf16 %v3841_v0  ;;  %v3171_v0 = vpack.i.bf16 %v3954_v38, %v3951_v60  ;;  %v2443_v60 = vld [vmem:[%s3387_s17 + $0x152] sm:$0xff]  ;;  %v2444_v38 = vld [vmem:[%s3387_s17 + $0x15a] sm:$0xff] }
  0xd5   : > { %v3959_v9 = vsel %vm1563_vm3, %v1545_v50, %v2849_v25  ;;  %v3962_v47 = vsel %vm1563_vm3, %v1546_v24, %v2850_v23  ;;  %3132 = vrot.lane.b32.xlu0 %v3909_v49, %s3349_s26  ;;  %v3166_v24 = vpack.i.bf16 %v3938_v51, %v3935_v45  ;;  %v1525_v45 = vsel %vm1497_vm1, %v3683_v44, %v2720_v58 }
  0xd6   : > { %v3969_v40 = vsel %vm1563_vm3, %v1543_v54, %v2844_v1  ;;  %v3972_v26 = vsel %vm1563_vm3, %v1544_v53, %v2845_v21  ;;  %v3974_v56 = vpop.permute.xlu1 %2857  ;;  %v1520_v54 = vsel %vm1497_vm1, %v3657_v33, %v2709_v59  ;;  %v1521_v53 = vsel %vm1497_vm1, %v3660_v36, %v2710_v13 }
  0xd7   : > { %v3976_v12 = vpop.permute.xlu0 %2852  ;;  %v1518_v21 = vsel %vm1497_vm1, %v3629_v19, %v2704_v16  ;;  %v1519_v1 = vsel %vm1497_vm1, %v3632_v20, %v2705_v62  ;;  %v2785_v33 = vunpack.i.h.bf16 %v3843_v15  ;;  %v1522_v19 = vsel %vm1497_vm1, %v3651_v31, %v2714_v3 }
  0xd8   : > { %3147 = vrot.lane.b32.xlu1 %v3620_v14, %s3350_s29  ;;  %v1523_v20 = vsel %vm1497_vm1, %v3654_v32, %v2715_v17  ;;  %v1553_v14 = vsel %vm1530_vm2, %v1520_v54, %v2789_v41  ;;  %v1554_v36 = vsel %vm1530_vm2, %v1521_v53, %v2790_v37  ;;  %v2800_v44 = vunpack.i.h.bf16 %v3849_v27  ;;  %v2495_v53 = vld [vmem:[%s3387_s17 + $0xd9] sm:$0xff] }
  0xd9   : > { %3142 = vrot.lane.b32.xlu0 %v3911_v7, %s3349_s26  ;;  %v2799_v13 = vunpack.i.l.bf16 %v3849_v27  ;;  %v2795_v16 = vunpack.i.h.bf16 %v3853_v4  ;;  %v2794_v58 = vunpack.i.l.bf16 %v3853_v4  ;;  %v1551_v32 = vsel %vm1530_vm2, %v1518_v21, %v2784_v30  ;;  %v2496_v21 = vld [vmem:[%s3387_s17 + $0xe1] sm:$0xff] }
  0xda   : > { %v2868_v43 = vpop.permute.xlu1 %2867  ;;  %v1552_v52 = vsel %vm1530_vm2, %v1519_v1, %v2785_v33  ;;  %v2725_v4 = vunpack.i.h.bf16 %v3795_v10  ;;  %v2724_v17 = vunpack.i.l.bf16 %v3795_v10  ;;  %v1558_v51 = vsel %vm1530_vm2, %v1525_v45, %v2800_v44 }
  0xdb   : > { %v2870_v59 = vunpack.i.h.bf16 %v2868_v43  ;;  %v2869_v15 = vunpack.i.l.bf16 %v2868_v43  ;;  %v2863_v62 = vpop.permute.xlu0 %2862  ;;  %v1557_v22 = vsel %vm1530_vm2, %v1524_v11, %v2799_v13  ;;  %v1555_v41 = vsel %vm1530_vm2, %v1522_v19, %v2794_v58 }
  0xdc   : > { %v2865_v31 = vunpack.i.h.bf16 %v2863_v62  ;;  %v2864_v35 = vunpack.i.l.bf16 %v2863_v62  ;;  %3157 = vrot.lane.b32.xlu1 %v3156_v48, %s3351_s30  ;;  %v1556_v48 = vsel %vm1530_vm2, %v1523_v20, %v2795_v16  ;;  %v2805_v1 = vunpack.i.h.bf16 %v3861_v28 }
  0xdd   : > { %v4016_v8 = vsel %vm1563_vm3, %v1553_v14, %v2869_v15  ;;  %v4019_v27 = vsel %vm1563_vm3, %v1554_v36, %v2870_v59  ;;  %3152 = vrot.lane.b32.xlu0 %v3693_v46, %s3350_s29  ;;  %v2804_v33 = vunpack.i.l.bf16 %v3861_v28  ;;  %v3181_v36 = vpack.i.bf16 %v2496_v21, %v2495_v53 }
  0xde   : > { %v4026_v3 = vsel %vm1563_vm3, %v1551_v32, %v2864_v35  ;;  %v4029_v23 = vsel %vm1563_vm3, %v1552_v52, %v2865_v31  ;;  %v2878_v25 = vpop.permute.xlu1 %2877  ;;  %v1526_v43 = vsel %vm1497_vm1, %v3674_v39, %v2724_v17  ;;  %v2535_v31 = vld [vmem:[%s3387_s17 + $0x13a] sm:$0xff]  ;;  %v4092_v32 = vld [vmem:[%s3387_s17 + $0x168] sm:$0xff]  ;;  %v4095_v52 = vld [vmem:[%s3387_s17 + $0x170] sm:$0xff]  ;;  %v2680_v17 = vunpack.i.h.bf16 %v3752_v34 }
  0xdf   : > { %v2880_v50 = vunpack.i.h.bf16 %v2878_v25  ;;  %v2879_v37 = vunpack.i.l.bf16 %v2878_v25  ;;  %v2873_v46 = vpop.permute.xlu0 %2872  ;;  %v1559_v59 = vsel %vm1530_vm2, %v1526_v43, %v2804_v33  ;;  %v2679_v25 = vunpack.i.l.bf16 %v3752_v34 }
  0xe0   : > { %v2875_v54 = vunpack.i.h.bf16 %v2873_v46  ;;  %v2874_v10 = vunpack.i.l.bf16 %v2873_v46  ;;  %3167 = vrot.lane.b32.xlu1 %v3166_v24, %s3351_s30  ;;  %v2674_v46 = vunpack.i.l.bf16 %v3754_v55  ;;  %v2755_v34 = vunpack.i.h.bf16 %v3819_v5 }
  0xe1   : > { %v4041_v11 = vsel %vm1563_vm3, %v1557_v22, %v2879_v37  ;;  %v4044_v45 = vsel %vm1563_vm3, %v1558_v51, %v2880_v50  ;;  %3162 = vrot.lane.b32.xlu0 %v3161_v61, %s3350_s29  ;;  %v1527_v61 = vsel %vm1497_vm1, %v3677_v42, %v2725_v4  ;;  %v2527_v42 = vld [vmem:[%s3387_s17 + $0xda] sm:$0xff]  ;;  %v4098_v4 = vld [vmem:[%s3387_s17 + $0x150] sm:$0xff]  ;;  %v4118_v21 = vpack.i.bf16 %v2444_v38, %v2443_v60 }
  0xe2   : > { %v4048_v30 = vsel %vm1563_vm3, %v1555_v41, %v2874_v10  ;;  %v4051_v19 = vsel %vm1563_vm3, %v1556_v48, %v2875_v54  ;;  %v2888_v24 = vpop.permute.xlu1 %2887  ;;  %v1560_v15 = vsel %vm1530_vm2, %v1527_v61, %v2805_v1  ;;  %v4104_v51 = vld [vmem:[%s3387_s17 + $0x158] sm:$0xff]  ;;  %v2507_v50 = vld [vmem:[%s3387_s17 + $0x169] sm:$0xff]  ;;  %v2760_v41 = vunpack.i.h.bf16 %v3817_v57 }
  0xe3   : > { %v2890_v20 = vunpack.i.h.bf16 %v2888_v24  ;;  %v2889_v14 = vunpack.i.l.bf16 %v2888_v24  ;;  %v2883_v28 = vpop.permute.xlu0 %2882  ;;  %v2508_v37 = vld [vmem:[%s3387_s17 + $0x171] sm:$0xff]  ;;  %v2759_v48 = vunpack.i.l.bf16 %v3817_v57  ;;  %v2754_v10 = vunpack.i.l.bf16 %v3819_v5 }
  0xe4   : > { %v2885_v44 = vunpack.i.h.bf16 %v2883_v28  ;;  %v2884_v13 = vunpack.i.l.bf16 %v2883_v28  ;;  %3177 = vrot.lane.b32.xlu1 %v3909_v49, %s3352_s4  ;;  %v2528_v49 = vld [vmem:[%s3387_s17 + $0xe2] sm:$0xff]  ;;  %v3216_v1 = vpack.i.bf16 %v4095_v52, %v4092_v32  ;;  %v2840_v33 = vunpack.i.h.bf16 %v3901_v6  ;;  %v4814_v61 = vld [vmem:[#allocation5_spill] sm:$0xff] }
  0xe5   : > { %v4063_v62 = vsel %vm1563_vm3, %v3870_v18, %v2889_v14  ;;  %v4067_v39 = vsel %vm1563_vm3, %v3873_v29, %v2890_v20  ;;  %3172 = vrot.lane.b32.xlu0 %v3171_v0, %s3351_s30  ;;  %v2536_v29 = vld [vmem:[%s3387_s17 + $0x142] sm:$0xff]  ;;  %v3196_v0 = vpack.i.bf16 %v2528_v49, %v2527_v42  ;;  %v3211_v57 = vpack.i.bf16 %v4104_v51, %v4098_v4  ;;  %v4812_v14 = vld [vmem:[#allocation24_spill] sm:$0xff] }
  0xe6   : > { %v4076_v16 = vsel %vm1563_vm3, %v1559_v59, %v2884_v13  ;;  %v4079_v58 = vsel %vm1563_vm3, %v1560_v15, %v2885_v44  ;;  %v4081_v18 = vpop.permute.xlu1 %2897  ;;  %v3191_v22 = vpack.i.bf16 %v2536_v29, %v2535_v31  ;;  %v4127_v24 = vpack.i.bf16 %v2508_v37, %v2507_v50 }
  0xe7   : > { %v4085_v35 = vpop.permute.xlu0 %2892  ;;  %v1508_v5 = vsel %vm1497_vm1, %v3593_v63, %v2679_v25  ;;  %v1509_v20 = vsel %vm1497_vm1, %v3596_v2, %v2680_v17  ;;  %v2835_v28 = vunpack.i.h.bf16 %v4812_v14  ;;  %v4815_v25 = vld [vmem:[#allocation12_spill] sm:$0xff] }
  0xe8   : > { %3187 = vrot.lane.b32.xlu1 %v3911_v7, %s3352_s4  ;;  %v2675_v7 = vunpack.i.h.bf16 %v3754_v55  ;;  %v2839_v55 = vunpack.i.l.bf16 %v3901_v6  ;;  %v4813_v6 = vld [vmem:[#allocation4_spill] sm:$0xff]  ;;  %v1541_v13 = vsel %vm1530_vm2, %v1508_v5, %v2759_v48  ;;  %v1542_v59 = vsel %vm1530_vm2, %v1509_v20, %v2760_v41  ;;  %v2506_v48 = vld [vmem:[%s3387_s17 + $0x159] sm:$0xff] }
  0xe9   : > { %3182 = vrot.lane.b32.xlu0 %v3181_v36, %s3351_s30  ;;  %v2834_v36 = vunpack.i.l.bf16 %v4812_v14  ;;  %v1506_v43 = vsel %vm1497_vm1, %v4813_v6, %v2674_v46  ;;  %v1575_v60 = vsel %vm1563_vm3, %v1542_v59, %v2840_v33  ;;  %v2700_v51 = vunpack.i.h.bf16 %v4815_v25  ;;  %v2505_v41 = vld [vmem:[%s3387_s17 + $0x151] sm:$0xff]  ;;  %v4817_v59 = vld [vmem:[#allocation6_spill] sm:$0xff] }
  0xea   : > { %v4112_v54 = vpop.permute.xlu1 %2907  ;;  %v1507_v44 = vsel %vm1497_vm1, %v4814_v61, %v2675_v7  ;;  %v1539_v15 = vsel %vm1530_vm2, %v1506_v43, %v2754_v10  ;;  %v1574_v29 = vsel %vm1563_vm3, %v1541_v13, %v2839_v55  ;;  %v2699_v50 = vunpack.i.l.bf16 %v4815_v25  ;;  %v2540_v13 = vld [vmem:[%s3387_s17 + $0x172] sm:$0xff]  ;;  %v2447_v25 = vld [vmem:[%s3387_s17 + $0x182] sm:$0xff] }
  0xeb   : > { %v4116_v53 = vpop.permute.xlu0 %2902  ;;  %v1540_v2 = vsel %vm1530_vm2, %v1507_v44, %v2755_v34  ;;  %v1572_v32 = vsel %vm1563_vm3, %v1539_v15, %v2834_v36  ;;  %v4816_v34 = vld [vmem:[#allocation18_spill] sm:$0xff]  ;;  %v2860_v20 = vunpack.i.h.bf16 %v3974_v56  ;;  %v2859_v14 = vunpack.i.l.bf16 %v3974_v56  ;;  %v2539_v44 = vld [vmem:[%s3387_s17 + $0x16a] sm:$0xff] }
  0xec   : > { %3197 = vrot.lane.b32.xlu1 %v3196_v0, %s3352_s4  ;;  %v1573_v52 = vsel %vm1563_vm3, %v1540_v2, %v2835_v28  ;;  %v2780_v10 = vunpack.i.h.bf16 %v4816_v34  ;;  %v2779_v33 = vunpack.i.l.bf16 %v4816_v34  ;;  %v3221_v61 = vpack.i.bf16 %v2506_v48, %v2505_v41  ;;  %v4217_v48 = vld [vmem:[%s3387_s17 + $0x198] sm:$0xff]  ;;  %v4220_v34 = vld [vmem:[%s3387_s17 + $0x1a0] sm:$0xff] }
  0xed   : > { %3192 = vrot.lane.b32.xlu0 %v3191_v22, %s3352_s4  ;;  %v1516_v56 = vsel %vm1497_vm1, %v4817_v59, %v2699_v50  ;;  %v4820_v59 = vld [vmem:[#allocation9_spill] sm:$0xff] }
  0xee   : > { %v2918_v63 = vpop.permute.xlu1 %2917 }
  0xef   : > { %v2920_v42 = vunpack.i.h.bf16 %v2918_v63  ;;  %v2919_v49 = vunpack.i.l.bf16 %v2918_v63  ;;  %v2913_v31 = vpop.permute.xlu0 %2912  ;;  %v4818_v63 = vld [vmem:[#allocation7_spill] sm:$0xff] }
  0xf0   : > { %v2915_v38 = vunpack.i.h.bf16 %v2913_v31  ;;  %v2914_v0 = vunpack.i.l.bf16 %v2913_v31  ;;  %3207 = vrot.lane.b32.xlu1 %v4118_v21, %s3349_s26  ;;  %v1517_v15 = vsel %vm1497_vm1, %v4818_v63, %v2700_v51  ;;  %v2448_v51 = vld [vmem:[%s3387_s17 + $0x18a] sm:$0xff]  ;;  %v2654_v63 = vunpack.i.l.bf16 %v4820_v59 }
  0xf1   : > { %v4151_v4 = vsel %vm1596_vm4, %v1574_v29, %v2919_v49  ;;  %v4154_v17 = vsel %vm1596_vm4, %v1575_v60, %v2920_v42  ;;  %3202 = vrot.lane.b32.xlu0 %v3191_v22, %s3349_s26  ;;  %v1550_v2 = vsel %vm1530_vm2, %v1517_v15, %v2780_v10 }
  0xf2   : > { %v4160_v37 = vsel %vm1596_vm4, %v1572_v32, %v2914_v0  ;;  %v4163_v7 = vsel %vm1596_vm4, %v1573_v52, %v2915_v38  ;;  %v2928_v46 = vpop.permute.xlu1 %2927  ;;  %v1583_v29 = vsel %vm1563_vm3, %v1550_v2, %v2860_v20  ;;  %v2415_v0 = vld [vmem:[%s3387_s17 + $0x181] sm:$0xff]  ;;  %v2416_v32 = vld [vmem:[%s3387_s17 + $0x189] sm:$0xff] }
  0xf3   : > { %v2930_v22 = vunpack.i.h.bf16 %v2928_v46  ;;  %v2929_v55 = vunpack.i.l.bf16 %v2928_v46  ;;  %v2923_v5 = vpop.permute.xlu0 %2922  ;;  %v183_v2 = vld [vmem:[%s3387_s17] sm:$0xff] }
  0xf4   : > { %v2925_v28 = vunpack.i.h.bf16 %v2923_v5  ;;  %v2924_v36 = vunpack.i.l.bf16 %v2923_v5  ;;  %3217 = vrot.lane.b32.xlu1 %v3216_v1, %s3350_s29 }
  0xf5   : > { %v4174_v6 = vsel %vm1596_vm4, %v3959_v9, %v2929_v55  ;;  %v4178_v43 = vsel %vm1596_vm4, %v3962_v47, %v2930_v22  ;;  %3212 = vrot.lane.b32.xlu0 %v3211_v57, %s3350_s29  ;;  %v1549_v57 = vsel %vm1530_vm2, %v1516_v56, %v2779_v33  ;;  %v4224_v22 = vpack.i.bf16 %v2416_v32, %v2415_v0  ;;  %v4819_v55 = vld [vmem:[#allocation8_spill] sm:$0xff]  ;;  %v4822_v32 = vld [vmem:[#allocation14_spill] sm:$0xff] }
  0xf6   : > { %v4189_v9 = vsel %vm1596_vm4, %v3969_v40, %v2924_v36  ;;  %v4193_v47 = vsel %vm1596_vm4, %v3972_v26, %v2925_v28  ;;  %v2938_v1 = vpop.permute.xlu1 %2937  ;;  %v1582_v40 = vsel %vm1563_vm3, %v1549_v57, %v2859_v14  ;;  %v4203_v26 = vpack.i.bf16 %v2540_v13, %v2539_v44  ;;  %v4240_v36 = vld [vmem:[%s3387_s17 + $0x180] sm:$0xff] }
  0xf7   : > { %v2940_v42 = vunpack.i.h.bf16 %v2938_v1  ;;  %v2939_v49 = vunpack.i.l.bf16 %v2938_v1  ;;  %v4197_v31 = vpop.permute.xlu0 %2932  ;;  %v4237_v28 = vpack.i.bf16 %v2448_v51, %v2447_v25  ;;  %v2655_v56 = vunpack.i.h.bf16 %v4820_v59 }
  0xf8   : > { %3227 = vrot.lane.b32.xlu1 %v4127_v24, %s3351_s30 }
  0xf9   : > { %v4206_v60 = vsel %vm1596_vm4, %v1582_v40, %v2939_v49  ;;  %v4209_v38 = vsel %vm1596_vm4, %v1583_v29, %v2940_v42  ;;  %3222 = vrot.lane.b32.xlu0 %v3221_v61, %s3351_s30  ;;  %v4243_v61 = vld [vmem:[%s3387_s17 + $0x188] sm:$0xff] }
  0xfa   : > { %v2948_v52 = vpop.permute.xlu1 %2947  ;;  %v4821_v42 = vld [vmem:[#allocation11_spill] sm:$0xff]  ;;  %v3261_v29 = vpack.i.bf16 %v4243_v61, %v4240_v36  ;;  %v4824_v36 = vld [vmem:[#allocation10_spill] sm:$0xff] }
  0xfb   : > { %v2950_v50 = vunpack.i.h.bf16 %v2948_v52  ;;  %v2949_v46 = vunpack.i.l.bf16 %v2948_v52  ;;  %v2943_v41 = vpop.permute.xlu0 %2942  ;;  %v2660_v49 = vunpack.i.h.bf16 %v4821_v42  ;;  %v2659_v0 = vunpack.i.l.bf16 %v4821_v42 }
  0xfc   : > { %v2945_v10 = vunpack.i.h.bf16 %v2943_v41  ;;  %v2944_v33 = vunpack.i.l.bf16 %v2943_v41  ;;  %3237 = vrot.lane.b32.xlu1 %v4203_v26, %s3352_s4  ;;  %v2740_v52 = vunpack.i.h.bf16 %v4822_v32  ;;  %v2739_v41 = vunpack.i.l.bf16 %v4822_v32 }
  0xfd   : > { %v4229_v20 = vsel %vm1596_vm4, %v4016_v8, %v2949_v46  ;;  %v4233_v14 = vsel %vm1596_vm4, %v4019_v27, %v2950_v50  ;;  %3232 = vrot.lane.b32.xlu0 %v4118_v21, %s3352_s4  ;;  %v3266_v21 = vpack.i.bf16 %v4220_v34, %v4217_v48  ;;  %v4278_v50 = vld [vmem:[%s3387_s17 + $0x199] sm:$0xff]  ;;  %v2512_v46 = vld [vmem:[%s3387_s17 + $0x1a1] sm:$0xff]  ;;  %v2670_v61 = vunpack.i.h.bf16 %v4824_v36 }
  0xfe   : > { %v4248_v8 = vsel %vm1596_vm4, %v4026_v3, %v2944_v33  ;;  %v4252_v27 = vsel %vm1596_vm4, %v4029_v23, %v2945_v10  ;;  %v2958_v13 = vpop.permute.xlu1 %2957  ;;  %v184_v3 = vld [vmem:[%s3387_s17 + $0x8] sm:$0xff] }
  0xff   : > { %v2960_v15 = vunpack.i.h.bf16 %v2958_v13  ;;  %v2959_v1 = vunpack.i.l.bf16 %v2958_v13  ;;  %v2953_v57 = vpop.permute.xlu0 %2952  ;;  %v4823_v48 = vld [vmem:[#allocation15_spill] sm:$0xff]  ;;  %v1499_v33 = vsel %vm1497_vm1, %v184_v3, %v2655_v56  ;;  %v3276_v56 = vpack.i.bf16 %v2512_v46, %v4278_v50 }
 0x100   : > { %v2955_v40 = vunpack.i.h.bf16 %v2953_v57  ;;  %v2954_v23 = vunpack.i.l.bf16 %v2953_v57  ;;  %3247 = vrot.lane.b32.xlu1 %v4224_v22, %s3348_s21  ;;  %v2734_v34 = vunpack.i.l.bf16 %v4823_v48  ;;  %v2735_v13 = vunpack.i.h.bf16 %v4823_v48  ;;  %v4827_v3 = vld [vmem:[#allocation3_spill] sm:$0xff] }
 0x101   : > { %v4269_v25 = vsel %vm1596_vm4, %v4041_v11, %v2959_v1  ;;  %v4273_v51 = vsel %vm1596_vm4, %v4044_v45, %v2960_v15  ;;  %3242 = vrot.lane.b32.xlu0 %v4127_v24, %s3348_s21  ;;  %v1498_v24 = vsel %vm1497_vm1, %v183_v2, %v2654_v63  ;;  %v4296_v15 = vld [vmem:[%s3387_s17 + $0x19a] sm:$0xff]  ;;  %v2669_v1 = vunpack.i.l.bf16 %v4824_v36 }
 0x102   : > { %v4285_v11 = vsel %vm1596_vm4, %v4048_v30, %v2954_v23  ;;  %v4289_v45 = vsel %vm1596_vm4, %v4051_v19, %v2955_v40  ;;  %v2968_v10 = vpop.permute.xlu1 %2967  ;;  %v4299_v30 = vld [vmem:[%s3387_s17 + $0x1a2] sm:$0xff]  ;;  %v4825_v19 = vld [vmem:[#allocation20_spill] sm:$0xff]  ;;  %v1501_v40 = vsel %vm1497_vm1, %v4827_v3, %v2660_v49  ;;  %v4828_v23 = vld [vmem:[#allocation21_spill] sm:$0xff]  ;;  %v1531_v50 = vsel %vm1530_vm2, %v1498_v24, %v2734_v34 }
 0x103   : > { %v2963_v59 = vpop.permute.xlu0 %2962  ;;  %v2820_v57 = vunpack.i.h.bf16 %v4825_v19  ;;  %v2819_v42 = vunpack.i.l.bf16 %v4825_v19  ;;  %v4826_v63 = vld [vmem:[#allocation2_spill] sm:$0xff]  ;;  %v2815_v32 = vunpack.i.h.bf16 %v4828_v23  ;;  %v2814_v48 = vunpack.i.l.bf16 %v4828_v23 }
 0x104   : > { %3257 = vrot.lane.b32.xlu1 %v4237_v28, %s3349_s26  ;;  %v1500_v2 = vsel %vm1497_vm1, %v4826_v63, %v2659_v0  ;;  %v1534_v5 = vsel %vm1530_vm2, %v1501_v40, %v2740_v52  ;;  %v3286_v0 = vpack.i.bf16 %v4299_v30, %v4296_v15  ;;  %v1532_v49 = vsel %vm1530_vm2, %v1499_v33, %v2735_v13  ;;  %v4829_v63 = vld [vmem:[#allocation16_spill] sm:$0xff] }
 0x105   : > { %3252 = vrot.lane.b32.xlu0 %v4203_v26, %s3349_s26  ;;  %v1533_v19 = vsel %vm1530_vm2, %v1500_v2, %v2739_v41  ;;  %v2900_v23 = vunpack.i.h.bf16 %v4081_v18  ;;  %v2899_v26 = vunpack.i.l.bf16 %v4081_v18  ;;  %v1567_v52 = vsel %vm1563_vm3, %v1534_v5, %v2820_v57 }
 0x106   : > { %v2978_v46 = vpop.permute.xlu1 %2977  ;;  %v1566_v41 = vsel %vm1563_vm3, %v1533_v19, %v2819_v42  ;;  %v2895_v34 = vunpack.i.h.bf16 %v4085_v35  ;;  %v2894_v24 = vunpack.i.l.bf16 %v4085_v35  ;;  %v1564_v15 = vsel %vm1563_vm3, %v1531_v50, %v2814_v48 }
 0x107   : > { %v2973_v44 = vpop.permute.xlu0 %2972  ;;  %v1565_v33 = vsel %vm1563_vm3, %v1532_v49, %v2815_v32  ;;  %v2970_v13 = vunpack.i.h.bf16 %v2968_v10  ;;  %v2969_v30 = vunpack.i.l.bf16 %v2968_v10  ;;  %v2965_v18 = vunpack.i.h.bf16 %v2963_v59 }
 0x108   : > { %3267 = vrot.lane.b32.xlu1 %v3266_v21, %s3350_s29  ;;  %v2964_v2 = vunpack.i.l.bf16 %v2963_v59  ;;  %v2980_v40 = vunpack.i.h.bf16 %v2978_v46  ;;  %v2979_v42 = vunpack.i.l.bf16 %v2978_v46  ;;  %v1599_v5 = vsel %vm1596_vm4, %v1566_v41, %v2899_v26 }
 0x109   : > { %3262 = vrot.lane.b32.xlu0 %v3261_v29, %s3350_s29  ;;  %v1600_v35 = vsel %vm1596_vm4, %v1567_v52, %v2900_v23  ;;  %v2975_v57 = vunpack.i.h.bf16 %v2973_v44  ;;  %v2974_v21 = vunpack.i.l.bf16 %v2973_v44  ;;  %v1597_v48 = vsel %vm1596_vm4, %v1564_v15, %v2894_v24 }
 0x10a   : > { %v2988_v19 = vpop.permute.xlu1 %2987  ;;  %v1598_v32 = vsel %vm1596_vm4, %v1565_v33, %v2895_v34  ;;  %v1632_v29 = vsel %vm1629_vm5, %v1599_v5, %v2969_v30  ;;  %v1633_v59 = vsel %vm1629_vm5, %v1600_v35, %v2970_v13  ;;  %v1630_v44 = vsel %vm1629_vm5, %v1597_v48, %v2964_v2 }
 0x10b   : > { %v2983_v3 = vpop.permute.xlu0 %2982  ;;  %v2990_v10 = vunpack.i.h.bf16 %v2988_v19  ;;  %v2989_v50 = vunpack.i.l.bf16 %v2988_v19  ;;  %v1631_v23 = vsel %vm1629_vm5, %v1598_v32, %v2965_v18  ;;  %v1665_v26 = vsel %vm1662_vm6, %v1632_v29, %v2979_v42 }
 0x10c   : > { %3277 = vrot.lane.b32.xlu1 %v3276_v56, %s3351_s30  ;;  %v2985_v46 = vunpack.i.h.bf16 %v2983_v3  ;;  %v2984_v49 = vunpack.i.l.bf16 %v2983_v3  ;;  %v1666_v41 = vsel %vm1662_vm6, %v1633_v59, %v2980_v40  ;;  %v1663_v56 = vsel %vm1662_vm6, %v1630_v44, %v2974_v21  ;;  %v4830_v21 = vld [vmem:[#allocation17_spill] sm:$0xff]  ;;  %v3332_v44 = vld [vmem:[%s3387_s17 + $0x50] sm:$0xff] }
 0x10d   : > { %3272 = vrot.lane.b32.xlu0 %v4224_v22, %s3351_s30  ;;  %v1664_v34 = vsel %vm1662_vm6, %v1631_v23, %v2975_v57  ;;  %v1698_v3 = vsel %vm1695_vm7, %v1665_v26, %v2989_v50  ;;  %v1699_v22 = vsel %vm1695_vm7, %v1666_v41, %v2990_v10  ;;  %v2749_v19 = vunpack.i.l.bf16 %v4829_v63  ;;  %v4831_v50 = vld [vmem:[#allocation22_spill] sm:$0xff]  ;;  %v4832_v26 = vld [vmem:[#allocation23_spill] sm:$0xff] }
 0x10e   : > { %v2998_v52 = vpop.permute.xlu1 %2997  ;;  %v1696_v40 = vsel %vm1695_vm7, %v1663_v56, %v2984_v49  ;;  %v1697_v42 = vsel %vm1695_vm7, %v1664_v34, %v2985_v46  ;;  %v2745_v48 = vunpack.i.h.bf16 %v4830_v21  ;;  %v2744_v32 = vunpack.i.l.bf16 %v4830_v21  ;;  %v3331_v46 = vld [vmem:[%s3387_s17 + $0x48] sm:$0xff]  ;;  %v3333_v56 = vld [vmem:[%s3387_s17 + $0x30] sm:$0xff] }
 0x10f   : > { %v3000_v24 = vunpack.i.h.bf16 %v2998_v52  ;;  %v2999_v15 = vunpack.i.l.bf16 %v2998_v52  ;;  %v2993_v33 = vpop.permute.xlu0 %2992  ;;  %v2830_v29 = vunpack.i.h.bf16 %v4831_v50  ;;  %v2829_v59 = vunpack.i.l.bf16 %v4831_v50 }
 0x110   : > { %v2995_v13 = vunpack.i.h.bf16 %v2993_v33  ;;  %v2994_v30 = vunpack.i.l.bf16 %v2993_v33  ;;  %3287 = vrot.lane.b32.xlu1 %v3286_v0, %s3352_s4  ;;  %v1504_v49 = vsel %vm1497_vm1, %v3331_v46, %v2669_v1  ;;  %v1505_v23 = vsel %vm1497_vm1, %v3332_v44, %v2670_v61 }
 0x111   : > { %v1731_v18 = vsel %vm1728_vm8, %v1698_v3, %v2999_v15  ;;  %v1732_v2 = vsel %vm1728_vm8, %v1699_v22, %v3000_v24  ;;  %3282 = vrot.lane.b32.xlu0 %v4237_v28, %s3352_s4  ;;  %v2825_v41 = vunpack.i.h.bf16 %v4832_v26  ;;  %v2824_v52 = vunpack.i.l.bf16 %v4832_v26  ;;  %v3334_v15 = vld [vmem:[%s3387_s17 + $0x38] sm:$0xff] }
 0x112   : > { %v1762_v5 = vpack.c.bf16 %v1732_v2, %v1731_v18  ;;  %v3008_v35 = vpop.permute.xlu1 %3007  ;;  %v1729_v0 = vsel %vm1728_vm8, %v1696_v40, %v2994_v30  ;;  %v1730_v57 = vsel %vm1728_vm8, %v1697_v42, %v2995_v13  ;;  %v4833_v34 = vunpack.i.l.bf16 %v4819_v55 }
 0x113   : > { %v3003_v28 = vpop.permute.xlu0 %3002  ;;  %v1761_v10 = vpack.c.bf16 %v1730_v57, %v1729_v0  ;;  %v4834_v33 = vunpack.i.h.bf16 %v4819_v55  ;;  %v1537_v36 = vsel %vm1530_vm2, %v1504_v49, %v2749_v19  ;;  %v4835_v61 = vunpack.i.h.bf16 %v4829_v63 }
 0x114   : > { %v1502_v24 = vsel %vm1497_vm1, %v3333_v56, %v4833_v34  ;;  %v2910_v18 = vunpack.i.h.bf16 %v4112_v54  ;;  %v2909_v2 = vunpack.i.l.bf16 %v4112_v54  ;;  %v1570_v40 = vsel %vm1563_vm3, %v1537_v36, %v2829_v59 }
 0x115   : > { %2594 = vmatprep.mubr.msk.bf16.mxu0 %vm1797_vm9, %v1761_v10  ;;  %v1503_v1 = vsel %vm1497_vm1, %v3334_v15, %v4834_v33  ;;  %v1538_v3 = vsel %vm1530_vm2, %v1505_v23, %v4835_v61  ;;  %v1535_v13 = vsel %vm1530_vm2, %v1502_v24, %v2744_v32  ;;  %v2905_v63 = vunpack.i.h.bf16 %v4116_v53 }
 0x116   : > { %2595 = vmatmul.mubr.msk.bf16.vlgmr.msra.gmra.mxu0 %vm1797_vm9, %v1762_v5  ;;  %v3018_v22 = vpop.permute.xlu1 %3017  ;;  %v1536_v30 = vsel %vm1530_vm2, %v1503_v1, %v2745_v48  ;;  %v1571_v42 = vsel %vm1563_vm3, %v1538_v3, %v2830_v29  ;;  %v2904_v19 = vunpack.i.l.bf16 %v4116_v53  ;;  %v1568_v5 = vsel %vm1563_vm3, %v1535_v13, %v2824_v52 }
 0x117   : > { %v3013_v55 = vpop.permute.xlu0 %3012  ;;  %v1569_v0 = vsel %vm1563_vm3, %v1536_v30, %v2825_v41  ;;  %v3010_v57 = vunpack.i.h.bf16 %v3008_v35  ;;  %v3009_v21 = vunpack.i.l.bf16 %v3008_v35  ;;  %v3005_v48 = vunpack.i.h.bf16 %v3003_v28 }
 0x118   : > { %v3004_v32 = vunpack.i.l.bf16 %v3003_v28  ;;  %v3020_v10 = vunpack.i.h.bf16 %v3018_v22  ;;  %v3019_v50 = vunpack.i.l.bf16 %v3018_v22  ;;  %v1603_v46 = vsel %vm1596_vm4, %v1570_v40, %v2909_v2 }
 0x119   : > { %v1604_v59 = vsel %vm1596_vm4, %v1571_v42, %v2910_v18  ;;  %v3015_v29 = vunpack.i.h.bf16 %v3013_v55  ;;  %v3014_v49 = vunpack.i.l.bf16 %v3013_v55  ;;  %v1601_v53 = vsel %vm1596_vm4, %v1568_v5, %v2904_v19 }
 0x11a   : > { %v3028_v54 = vpop.permute.xlu1 %3027  ;;  %v1602_v23 = vsel %vm1596_vm4, %v1569_v0, %v2905_v63  ;;  %v1636_v35 = vsel %vm1629_vm5, %v1603_v46, %v3009_v21  ;;  %v1637_v28 = vsel %vm1629_vm5, %v1604_v59, %v3010_v57  ;;  %v1634_v34 = vsel %vm1629_vm5, %v1601_v53, %v3004_v32  ;;  %v4836_v46 = vld [vmem:[#allocation13_spill] sm:$0xff] }
 0x11b   : > { %v3023_v44 = vpop.permute.xlu0 %3022  ;;  %v3030_v26 = vunpack.i.h.bf16 %v3028_v54  ;;  %v3029_v41 = vunpack.i.l.bf16 %v3028_v54  ;;  %v1635_v24 = vsel %vm1629_vm5, %v1602_v23, %v3005_v48  ;;  %v1669_v15 = vsel %vm1662_vm6, %v1636_v35, %v3019_v50 }
 0x11c   : > { %v3025_v52 = vunpack.i.h.bf16 %v3023_v44  ;;  %v3024_v56 = vunpack.i.l.bf16 %v3023_v44  ;;  %v1670_v33 = vsel %vm1662_vm6, %v1637_v28, %v3020_v10  ;;  %v1667_v36 = vsel %vm1662_vm6, %v1634_v34, %v3014_v49  ;;  %v4837_v44 = vld [vmem:[#allocation19_spill] sm:$0xff]  ;;  %v3335_v28 = vld [vmem:[%s3387_s17 + $0xc0] sm:$0xff] }
 0x11d   : > { %v1668_v61 = vsel %vm1662_vm6, %v1635_v24, %v3015_v29  ;;  %v1702_v30 = vsel %vm1695_vm7, %v1669_v15, %v3029_v41  ;;  %v1703_v18 = vsel %vm1695_vm7, %v1670_v33, %v3030_v26  ;;  %v2694_v59 = vunpack.i.l.bf16 %v4836_v46  ;;  %v3336_v15 = vld [vmem:[%s3387_s17 + $0xc8] sm:$0xff] }
 0x11e   : > { %v3038_v1 = vpop.permute.xlu1 %3037  ;;  %v1700_v40 = vsel %vm1695_vm7, %v1667_v36, %v3024_v56  ;;  %v1701_v42 = vsel %vm1695_vm7, %v1668_v61, %v3025_v52  ;;  %v2695_v49 = vunpack.i.h.bf16 %v4836_v46  ;;  %v2774_v53 = vunpack.i.l.bf16 %v4837_v44 }
 0x11f   : > { %v3040_v3 = vunpack.i.h.bf16 %v3038_v1  ;;  %v3039_v22 = vunpack.i.l.bf16 %v3038_v1  ;;  %v3033_v13 = vpop.permute.xlu0 %3032  ;;  %v2775_v23 = vunpack.i.h.bf16 %v4837_v44  ;;  %v2854_v26 = vunpack.i.l.bf16 %v3976_v12 }
 0x120   : > { %v3035_v2 = vunpack.i.h.bf16 %v3033_v13  ;;  %v3034_v55 = vunpack.i.l.bf16 %v3033_v13  ;;  %v2855_v41 = vunpack.i.h.bf16 %v3976_v12  ;;  %v1514_v52 = vsel %vm1497_vm1, %v3335_v28, %v2694_v59 }
 0x121   : > { %v1735_v63 = vsel %vm1728_vm8, %v1702_v30, %v3039_v22  ;;  %v1736_v19 = vsel %vm1728_vm8, %v1703_v18, %v3040_v3  ;;  %v2935_v56 = vunpack.i.h.bf16 %v4197_v31  ;;  %v2934_v34 = vunpack.i.l.bf16 %v4197_v31 }
 0x122   : > { %v1764_v5 = vpack.c.bf16 %v1736_v19, %v1735_v63  ;;  %v1733_v0 = vsel %vm1728_vm8, %v1700_v40, %v3034_v55  ;;  %v1734_v57 = vsel %vm1728_vm8, %v1701_v42, %v3035_v2  ;;  %v3048_v21 = vpop.permute.xlu1 %3047  ;;  %v1515_v33 = vsel %vm1497_vm1, %v3336_v15, %v2695_v49 }
 0x123   : > { %v1763_v48 = vpack.c.bf16 %v1734_v57, %v1733_v0  ;;  %v3043_v32 = vpop.permute.xlu0 %3042  ;;  %v1547_v1 = vsel %vm1530_vm2, %v1514_v52, %v2774_v53  ;;  %v3050_v36 = vunpack.i.h.bf16 %v3048_v21  ;;  %v3049_v61 = vunpack.i.l.bf16 %v3048_v21 }
 0x124   : > { %v1548_v3 = vsel %vm1530_vm2, %v1515_v33, %v2775_v23  ;;  %v1580_v12 = vsel %vm1563_vm3, %v1547_v1, %v2854_v26  ;;  %v3045_v22 = vunpack.i.h.bf16 %v3043_v32  ;;  %v3044_v13 = vunpack.i.l.bf16 %v3043_v32 }
 0x125   : > { %2598 = vmatprep.mubr.msk.bf16.mxu0 %vm1797_vm9, %v1763_v48  ;;  %v1581_v30 = vsel %vm1563_vm3, %v1548_v3, %v2855_v41  ;;  %v1613_v40 = vsel %vm1596_vm4, %v1580_v12, %v2934_v34  ;;  %v1639_v0 = vsel %vm1629_vm5, %v4163_v7, %v3050_v36 }
 0x126   : > { %2599 = vmatmul.mubr.msk.bf16.gmra.mxu0 %vm1797_vm9, %v1764_v5  ;;  %v3058_v10 = vpop.permute.xlu1 %3057  ;;  %v1614_v42 = vsel %vm1596_vm4, %v1581_v30, %v2935_v56  ;;  %v1638_v5 = vsel %vm1629_vm5, %v4160_v37, %v3049_v61  ;;  %v1646_v48 = vsel %vm1629_vm5, %v1613_v40, %v3044_v13 }
 0x127   : > { %v3053_v50 = vpop.permute.xlu0 %3052  ;;  %v3060_v18 = vunpack.i.h.bf16 %v3058_v10  ;;  %v3059_v2 = vunpack.i.l.bf16 %v3058_v10  ;;  %v1647_v32 = vsel %vm1629_vm5, %v1614_v42, %v3045_v22 }
 0x128   : > { %v3054_v31 = vunpack.i.l.bf16 %v3053_v50  ;;  %v3055_v63 = vunpack.i.h.bf16 %v3053_v50 }
 0x129   : > { %v1679_v59 = vsel %vm1662_vm6, %v1646_v48, %v3059_v2  ;;  %v1680_v49 = vsel %vm1662_vm6, %v1647_v32, %v3060_v18 }
 0x12a   : > { %v3068_v54 = vpop.permute.xlu1 %3067  ;;  %v1648_v50 = vsel %vm1629_vm5, %v4206_v60, %v3054_v31  ;;  %v1649_v7 = vsel %vm1629_vm5, %v4209_v38, %v3055_v63 }
 0x12b   : > { %v4420_v29 = vpop.permute.xlu0 %3062  ;;  %v3070_v10 = vunpack.i.h.bf16 %v3068_v54  ;;  %v3069_v46 = vunpack.i.l.bf16 %v3068_v54 }
 0x12c   : > { %v3064_v37 = vunpack.i.l.bf16 %v4420_v29  ;;  %v3065_v53 = vunpack.i.h.bf16 %v4420_v29 }
 0x12d   : > { %v1671_v56 = vsel %vm1662_vm6, %v1638_v5, %v3069_v46  ;;  %v1672_v60 = vsel %vm1662_vm6, %v1639_v0, %v3070_v10 }
 0x12e   : > { %v3078_v35 = vpop.permute.xlu1 %3077  ;;  %v1640_v38 = vsel %vm1629_vm5, %v4151_v4, %v3064_v37  ;;  %v1641_v42 = vsel %vm1629_vm5, %v4154_v17, %v3065_v53 }
 0x12f   : > { %v4431_v24 = vpop.permute.xlu0 %3072  ;;  %v3080_v57 = vunpack.i.h.bf16 %v3078_v35  ;;  %v3079_v21 = vunpack.i.l.bf16 %v3078_v35 }
 0x130   : > { %v3075_v29 = vunpack.i.h.bf16 %v4431_v24  ;;  %v3074_v33 = vunpack.i.l.bf16 %v4431_v24 }
 0x131   : > { %v1712_v28 = vsel %vm1695_vm7, %v1679_v59, %v3079_v21  ;;  %v1713_v52 = vsel %vm1695_vm7, %v1680_v49, %v3080_v57 }
 0x132   : > { %v3088_v55 = vpop.permute.xlu1 %3087  ;;  %v1681_v63 = vsel %vm1662_vm6, %v1648_v50, %v3074_v33 }
 0x133   : > { %v3083_v19 = vpop.permute.xlu0 %3082  ;;  %v3090_v35 = vunpack.i.h.bf16 %v3088_v55  ;;  %v3089_v54 = vunpack.i.l.bf16 %v3088_v55 }
 0x134   : > { %v3085_v61 = vunpack.i.h.bf16 %v3083_v19  ;;  %v3084_v3 = vunpack.i.l.bf16 %v3083_v19  ;;  %v1682_v19 = vsel %vm1662_vm6, %v1649_v7, %v3075_v29 }
 0x135   : > { %v1704_v30 = vsel %vm1695_vm7, %v1671_v56, %v3089_v54  ;;  %v1705_v18 = vsel %vm1695_vm7, %v1672_v60, %v3090_v35 }
 0x136   : > { %v3098_v44 = vpop.permute.xlu1 %3097  ;;  %v1673_v57 = vsel %vm1662_vm6, %v1640_v38, %v3084_v3  ;;  %v1674_v21 = vsel %vm1662_vm6, %v1641_v42, %v3085_v61 }
 0x137   : > { %v3100_v23 = vunpack.i.h.bf16 %v3098_v44  ;;  %v3099_v26 = vunpack.i.l.bf16 %v3098_v44  ;;  %v3093_v41 = vpop.permute.xlu0 %3092 }
 0x138   : > { %v3095_v4 = vunpack.i.h.bf16 %v3093_v41  ;;  %v3094_v55 = vunpack.i.l.bf16 %v3093_v41 }
 0x139   : > { %v1745_v34 = vsel %vm1728_vm8, %v1712_v28, %v3099_v26  ;;  %v1746_v15 = vsel %vm1728_vm8, %v1713_v52, %v3100_v23 }
 0x13a   : > { %v3108_v1 = vpop.permute.xlu1 %3107  ;;  %v1769_v36 = vpack.c.bf16 %v1746_v15, %v1745_v34  ;;  %v1714_v17 = vsel %vm1695_vm7, %v1681_v63, %v3094_v55  ;;  %v1715_v50 = vsel %vm1695_vm7, %v1682_v19, %v3095_v4 }
 0x13b   : > { %v3110_v12 = vunpack.i.h.bf16 %v3108_v1  ;;  %v3109_v22 = vunpack.i.l.bf16 %v3108_v1  ;;  %v3103_v13 = vpop.permute.xlu0 %3102 }
 0x13c   : > { %v3105_v2 = vunpack.i.h.bf16 %v3103_v13  ;;  %v3104_v31 = vunpack.i.l.bf16 %v3103_v13  ;;  %2610 = vmatprep.mubr.msk.bf16.mxu1 %vm1797_vm9, %v1769_v36 }
 0x13d   : > { %v1737_v40 = vsel %vm1728_vm8, %v1704_v30, %v3109_v22  ;;  %v1738_v24 = vsel %vm1728_vm8, %v1705_v18, %v3110_v12 }
 0x13e   : > { %v1765_v5 = vpack.c.bf16 %v1738_v24, %v1737_v40  ;;  %v3118_v0 = vpop.permute.xlu1 %3117  ;;  %v1706_v46 = vsel %vm1695_vm7, %v1673_v57, %v3104_v31  ;;  %v1707_v59 = vsel %vm1695_vm7, %v1674_v21, %v3105_v2 }
 0x13f   : > { %v3120_v48 = vunpack.i.h.bf16 %v3118_v0  ;;  %v3119_v32 = vunpack.i.l.bf16 %v3118_v0  ;;  %v3113_v10 = vpop.permute.xlu0 %3112 }
 0x140   : > { %v3115_v49 = vunpack.i.h.bf16 %v3113_v10  ;;  %v3114_v37 = vunpack.i.l.bf16 %v3113_v10  ;;  %2602 = vmatprep.mubr.msk.bf16.mxu0 %vm1797_vm9, %v1765_v5 }
 0x141   : > { %v1739_v44 = vsel %vm1728_vm8, %v1706_v46, %v3119_v32  ;;  %v1740_v7 = vsel %vm1728_vm8, %v1707_v59, %v3120_v48 }
 0x142   : > { %v1766_v53 = vpack.c.bf16 %v1740_v7, %v1739_v44  ;;  %v1747_v23 = vsel %vm1728_vm8, %v1714_v17, %v3114_v37  ;;  %v1748_v26 = vsel %vm1728_vm8, %v1715_v50, %v3115_v49  ;;  %v3128_v41 = vpop.permute.xlu1 %3127 }
 0x143   : > { %v1770_v35 = vpack.c.bf16 %v1748_v26, %v1747_v23  ;;  %v3123_v54 = vpop.permute.xlu0 %3122  ;;  %v3130_v38 = vunpack.i.h.bf16 %v3128_v41  ;;  %v3129_v29 = vunpack.i.l.bf16 %v3128_v41 }
 0x144   : > { %2603 = vmatmul.mubr.msk.bf16.gmra.mxu0 %vm1797_vm9, %v1766_v53  ;;  %v3125_v33 = vunpack.i.h.bf16 %v3123_v54  ;;  %v3124_v1 = vunpack.i.l.bf16 %v3123_v54 }
 0x145   : > { %2611 = vmatmul.mubr.msk.bf16.vlgmr.msra.gmra.mxu1 %vm1797_vm9, %v1770_v35  ;;  %v1642_v30 = vsel %vm1629_vm5, %v4189_v9, %v3129_v29  ;;  %v1643_v18 = vsel %vm1629_vm5, %v4193_v47, %v3130_v38 }
 0x146   : > { %v3138_v28 = vpop.permute.xlu1 %3137  ;;  %v1650_v4 = vsel %vm1629_vm5, %v4248_v8, %v3124_v1  ;;  %v1651_v55 = vsel %vm1629_vm5, %v4252_v27, %v3125_v33 }
 0x147   : > { %v3133_v52 = vpop.permute.xlu0 %3132  ;;  %v3140_v36 = vunpack.i.h.bf16 %v3138_v28  ;;  %v3139_v61 = vunpack.i.l.bf16 %v3138_v28 }
 0x148   : > { %v3134_v3 = vunpack.i.l.bf16 %v3133_v52  ;;  %v3135_v22 = vunpack.i.h.bf16 %v3133_v52 }
 0x149   : > { %v1683_v42 = vsel %vm1662_vm6, %v1650_v4, %v3139_v61  ;;  %v1684_v63 = vsel %vm1662_vm6, %v1651_v55, %v3140_v36 }
 0x14a   : > { %v3148_v56 = vpop.permute.xlu1 %3147  ;;  %v1652_v9 = vsel %vm1629_vm5, %v4229_v20, %v3134_v3  ;;  %v1653_v47 = vsel %vm1629_vm5, %v4233_v14, %v3135_v22 }
 0x14b   : > { %v3143_v60 = vpop.permute.xlu0 %3142  ;;  %v3150_v40 = vunpack.i.h.bf16 %v3148_v56  ;;  %v3149_v24 = vunpack.i.l.bf16 %v3148_v56 }
 0x14c   : > { %v3144_v19 = vunpack.i.l.bf16 %v3143_v60  ;;  %v3145_v0 = vunpack.i.h.bf16 %v3143_v60 }
 0x14d   : > { %v1675_v46 = vsel %vm1662_vm6, %v1642_v30, %v3149_v24  ;;  %v1676_v59 = vsel %vm1662_vm6, %v1643_v18, %v3150_v40 }
 0x14e   : > { %v3158_v34 = vpop.permute.xlu1 %3157  ;;  %v1644_v14 = vsel %vm1629_vm5, %v4174_v6, %v3144_v19 }
 0x14f   : > { %v3153_v15 = vpop.permute.xlu0 %3152  ;;  %v3160_v2 = vunpack.i.h.bf16 %v3158_v34  ;;  %v3159_v31 = vunpack.i.l.bf16 %v3158_v34 }
 0x150   : > { %v3155_v37 = vunpack.i.h.bf16 %v3153_v15  ;;  %v3154_v17 = vunpack.i.l.bf16 %v3153_v15  ;;  %v1645_v15 = vsel %vm1629_vm5, %v4178_v43, %v3145_v0 }
 0x151   : > { %v1716_v27 = vsel %vm1695_vm7, %v1683_v42, %v3159_v31  ;;  %v1717_v48 = vsel %vm1695_vm7, %v1684_v63, %v3160_v2 }
 0x152   : > { %v3168_v12 = vpop.permute.xlu1 %3167  ;;  %v1685_v38 = vsel %vm1662_vm6, %v1652_v9, %v3154_v17  ;;  %v1686_v29 = vsel %vm1662_vm6, %v1653_v47, %v3155_v37 }
 0x153   : > { %v3163_v13 = vpop.permute.xlu0 %3162  ;;  %v3170_v32 = vunpack.i.h.bf16 %v3168_v12  ;;  %v3169_v10 = vunpack.i.l.bf16 %v3168_v12 }
 0x154   : > { %v3165_v7 = vunpack.i.h.bf16 %v3163_v13  ;;  %v3164_v53 = vunpack.i.l.bf16 %v3163_v13 }
 0x155   : > { %v1708_v35 = vsel %vm1695_vm7, %v1675_v46, %v3169_v10  ;;  %v1709_v54 = vsel %vm1695_vm7, %v1676_v59, %v3170_v32 }
 0x156   : > { %v3178_v5 = vpop.permute.xlu1 %3177  ;;  %v1677_v36 = vsel %vm1662_vm6, %v1644_v14, %v3164_v53  ;;  %v1678_v61 = vsel %vm1662_vm6, %v1645_v15, %v3165_v7 }
 0x157   : > { %v3180_v57 = vunpack.i.h.bf16 %v3178_v5  ;;  %v3179_v8 = vunpack.i.l.bf16 %v3178_v5  ;;  %v3173_v21 = vpop.permute.xlu0 %3172 }
 0x158   : > { %v3175_v56 = vunpack.i.h.bf16 %v3173_v21  ;;  %v3174_v60 = vunpack.i.l.bf16 %v3173_v21 }
 0x159   : > { %v1749_v20 = vsel %vm1728_vm8, %v1716_v27, %v3179_v8  ;;  %v1750_v49 = vsel %vm1728_vm8, %v1717_v48, %v3180_v57 }
 0x15a   : > { %v1771_v50 = vpack.c.bf16 %v1750_v49, %v1749_v20  ;;  %v3188_v44 = vpop.permute.xlu1 %3187  ;;  %v1718_v43 = vsel %vm1695_vm7, %v1685_v38, %v3174_v60  ;;  %v1719_v31 = vsel %vm1695_vm7, %v1686_v29, %v3175_v56 }
 0x15b   : > { %v3190_v23 = vunpack.i.h.bf16 %v3188_v44  ;;  %v3189_v26 = vunpack.i.l.bf16 %v3188_v44  ;;  %v3183_v41 = vpop.permute.xlu0 %3182 }
 0x15c   : > { %v3185_v28 = vunpack.i.h.bf16 %v3183_v41  ;;  %v3184_v52 = vunpack.i.l.bf16 %v3183_v41  ;;  %2614 = vmatprep.mubr.msk.bf16.mxu1 %vm1797_vm9, %v1771_v50 }
 0x15d   : > { %v1741_v6 = vsel %vm1728_vm8, %v1708_v35, %v3189_v26  ;;  %v1742_v34 = vsel %vm1728_vm8, %v1709_v54, %v3190_v23 }
 0x15e   : > { %v1767_v33 = vpack.c.bf16 %v1742_v34, %v1741_v6  ;;  %v3198_v1 = vpop.permute.xlu1 %3197  ;;  %v1710_v13 = vsel %vm1695_vm7, %v1677_v36, %v3184_v52  ;;  %v1711_v30 = vsel %vm1695_vm7, %v1678_v61, %v3185_v28 }
 0x15f   : > { %v3200_v3 = vunpack.i.h.bf16 %v3198_v1  ;;  %v3199_v12 = vunpack.i.l.bf16 %v3198_v1  ;;  %v3193_v22 = vpop.permute.xlu0 %3192 }
 0x160   : > { %v3195_v18 = vunpack.i.h.bf16 %v3193_v22  ;;  %v3194_v2 = vunpack.i.l.bf16 %v3193_v22  ;;  %2606 = vmatprep.mubr.msk.bf16.mxu0 %vm1797_vm9, %v1767_v33 }
 0x161   : > { %v1743_v4 = vsel %vm1728_vm8, %v1710_v13, %v3199_v12  ;;  %v1744_v55 = vsel %vm1728_vm8, %v1711_v30, %v3200_v3 }
 0x162   : > { %v1768_v40 = vpack.c.bf16 %v1744_v55, %v1743_v4  ;;  %v1751_v24 = vsel %vm1728_vm8, %v1718_v43, %v3194_v2  ;;  %v1752_v42 = vsel %vm1728_vm8, %v1719_v31, %v3195_v18  ;;  %v3208_v63 = vpop.permute.xlu1 %3207 }
 0x163   : > { %v1772_v9 = vpack.c.bf16 %v1752_v42, %v1751_v24  ;;  %v3203_v19 = vpop.permute.xlu0 %3202  ;;  %v3210_v0 = vunpack.i.h.bf16 %v3208_v63  ;;  %v3209_v57 = vunpack.i.l.bf16 %v3208_v63 }
 0x164   : > { %2607 = vmatmul.mubr.msk.bf16.gmra.mxu0 %vm1797_vm9, %v1768_v40  ;;  %v3205_v8 = vunpack.i.h.bf16 %v3203_v19  ;;  %v3204_v21 = vunpack.i.l.bf16 %v3203_v19 }
 0x165   : > { %2615 = vmatmul.mubr.msk.bf16.gmra.mxu1 %vm1797_vm9, %v1772_v9  ;;  %v1656_v14 = vsel %vm1629_vm5, %v4269_v25, %v3209_v57  ;;  %v1657_v37 = vsel %vm1629_vm5, %v4273_v51, %v3210_v0 }
 0x166   : > { %v3218_v5 = vpop.permute.xlu1 %3217  ;;  %v1654_v44 = vsel %vm1629_vm5, %v4285_v11, %v3204_v21  ;;  %v1655_v7 = vsel %vm1629_vm5, %v4289_v45, %v3205_v8 }
 0x167   : > { %v3213_v47 = vpop.permute.xlu0 %3212  ;;  %v3220_v27 = vunpack.i.h.bf16 %v3218_v5  ;;  %v3219_v48 = vunpack.i.l.bf16 %v3218_v5 }
 0x168   : > { %v3215_v10 = vunpack.i.h.bf16 %v3213_v47  ;;  %v3214_v46 = vunpack.i.l.bf16 %v3213_v47 }
 0x169   : > { %v1689_v53 = vsel %vm1662_vm6, %v1656_v14, %v3219_v48  ;;  %v1690_v23 = vsel %vm1662_vm6, %v1657_v37, %v3220_v27 }
 0x16a   : > { %v3228_v32 = vpop.permute.xlu1 %3227  ;;  %v1687_v41 = vsel %vm1662_vm6, %v1654_v44, %v3214_v46  ;;  %v1688_v25 = vsel %vm1662_vm6, %v1655_v7, %v3215_v10 }
 0x16b   : > { %v3223_v59 = vpop.permute.xlu0 %3222  ;;  %v3230_v20 = vunpack.i.h.bf16 %v3228_v32  ;;  %v3229_v49 = vunpack.i.l.bf16 %v3228_v32 }
 0x16c   : > { %v3225_v17 = vunpack.i.h.bf16 %v3223_v59  ;;  %v3224_v50 = vunpack.i.l.bf16 %v3223_v59 }
 0x16d   : > { %v1722_v28 = vsel %vm1695_vm7, %v1689_v53, %v3229_v49  ;;  %v1723_v52 = vsel %vm1695_vm7, %v1690_v23, %v3230_v20 }
 0x16e   : > { %v3238_v26 = vpop.permute.xlu1 %3237  ;;  %v1720_v45 = vsel %vm1695_vm7, %v1687_v41, %v3224_v50  ;;  %v1721_v60 = vsel %vm1695_vm7, %v1688_v25, %v3225_v17 }
 0x16f   : > { %v3240_v35 = vunpack.i.h.bf16 %v3238_v26  ;;  %v3239_v54 = vunpack.i.l.bf16 %v3238_v26  ;;  %v3233_v51 = vpop.permute.xlu0 %3232 }
 0x170   : > { %v3235_v11 = vunpack.i.h.bf16 %v3233_v51  ;;  %v3234_v56 = vunpack.i.l.bf16 %v3233_v51 }
 0x171   : > { %v1755_v6 = vsel %vm1728_vm8, %v1722_v28, %v3239_v54  ;;  %v1756_v34 = vsel %vm1728_vm8, %v1723_v52, %v3240_v35 }
 0x172   : > { %v1774_v15 = vpack.c.bf16 %v1756_v34, %v1755_v6  ;;  %v1753_v38 = vsel %vm1728_vm8, %v1720_v45, %v3234_v56  ;;  %v1754_v29 = vsel %vm1728_vm8, %v1721_v60, %v3235_v11  ;;  %v3248_v33 = vpop.permute.xlu1 %3247 }
 0x173   : > { %v1773_v1 = vpack.c.bf16 %v1754_v29, %v1753_v38  ;;  %v3243_v36 = vpop.permute.xlu0 %3242  ;;  %v3250_v22 = vunpack.i.h.bf16 %v3248_v33  ;;  %v3249_v13 = vunpack.i.l.bf16 %v3248_v33 }
 0x174   : > { %v3245_v18 = vunpack.i.h.bf16 %v3243_v36  ;;  %v3244_v2 = vunpack.i.l.bf16 %v3243_v36 }
 0x175   : > { %2618 = vmatprep.mubr.msk.bf16.mxu1 %vm1797_vm9, %v1773_v1  ;;  %v1627_v63 = vsel %vm1596_vm4, %v4063_v62, %v3249_v13  ;;  %v1628_v9 = vsel %vm1596_vm4, %v4067_v39, %v3250_v22 }
 0x176   : > { %2619 = vmatmul.mubr.msk.bf16.gmra.mxu1 %vm1797_vm9, %v1774_v15  ;;  %v3258_v61 = vpop.permute.xlu1 %3257  ;;  %v1625_v0 = vsel %vm1596_vm4, %v4076_v16, %v3244_v2  ;;  %v1626_v57 = vsel %vm1596_vm4, %v4079_v58, %v3245_v18 }
 0x177   : > { %v3253_v3 = vpop.permute.xlu0 %3252  ;;  %v3260_v43 = vunpack.i.h.bf16 %v3258_v61  ;;  %v3259_v31 = vunpack.i.l.bf16 %v3258_v61 }
 0x178   : > { %v3255_v4 = vunpack.i.h.bf16 %v3253_v3  ;;  %v3254_v55 = vunpack.i.l.bf16 %v3253_v3 }
 0x179   : > { %v1660_v27 = vsel %vm1629_vm5, %v1627_v63, %v3259_v31  ;;  %v1661_v48 = vsel %vm1629_vm5, %v1628_v9, %v3260_v43 }
 0x17a   : > { %v3268_v12 = vpop.permute.xlu1 %3267  ;;  %v1658_v10 = vsel %vm1629_vm5, %v1625_v0, %v3254_v55  ;;  %v1659_v39 = vsel %vm1629_vm5, %v1626_v57, %v3255_v4 }
 0x17b   : > { %v3263_v30 = vpop.permute.xlu0 %3262  ;;  %v3270_v40 = vunpack.i.h.bf16 %v3268_v12  ;;  %v3269_v24 = vunpack.i.l.bf16 %v3268_v12 }
 0x17c   : > { %v3265_v19 = vunpack.i.h.bf16 %v3263_v30  ;;  %v3264_v5 = vunpack.i.l.bf16 %v3263_v30 }
 0x17d   : > { %v1693_v46 = vsel %vm1662_vm6, %v1660_v27, %v3269_v24  ;;  %v1694_v59 = vsel %vm1662_vm6, %v1661_v48, %v3270_v40 }
 0x17e   : > { %v3278_v42 = vpop.permute.xlu1 %3277  ;;  %v1691_v20 = vsel %vm1662_vm6, %v1658_v10, %v3264_v5  ;;  %v1692_v58 = vsel %vm1662_vm6, %v1659_v39, %v3265_v19 }
 0x17f   : > { %v3273_v47 = vpop.permute.xlu0 %3272  ;;  %v3280_v8 = vunpack.i.h.bf16 %v3278_v42  ;;  %v3279_v21 = vunpack.i.l.bf16 %v3278_v42 }
 0x180   : > { %v3275_v32 = vunpack.i.h.bf16 %v3273_v47  ;;  %v3274_v62 = vunpack.i.l.bf16 %v3273_v47 }
 0x181   : > { %v1726_v17 = vsel %vm1695_vm7, %v1693_v46, %v3279_v21  ;;  %v1727_v50 = vsel %vm1695_vm7, %v1694_v59, %v3280_v8 }
 0x182   : > { %v3288_v16 = vpop.permute.xlu1 %3287  ;;  %v1724_v53 = vsel %vm1695_vm7, %v1691_v20, %v3274_v62  ;;  %v1725_v23 = vsel %vm1695_vm7, %v1692_v58, %v3275_v32 }
 0x183   : > { %v3290_v49 = vunpack.i.h.bf16 %v3288_v16  ;;  %v3289_v14 = vunpack.i.l.bf16 %v3288_v16  ;;  %v3283_v37 = vpop.permute.xlu0 %3282 }
 0x184   : > { %v3285_v44 = vunpack.i.h.bf16 %v3283_v37  ;;  %v3284_v7 = vunpack.i.l.bf16 %v3283_v37 }
 0x185   : > { %v1759_v26 = vsel %vm1728_vm8, %v1726_v17, %v3289_v14  ;;  %v1760_v41 = vsel %vm1728_vm8, %v1727_v50, %v3290_v49 }
 0x186   : > { %v1776_v25 = vpack.c.bf16 %v1760_v41, %v1759_v26  ;;  %v1757_v35 = vsel %vm1728_vm8, %v1724_v53, %v3284_v7  ;;  %v1758_v54 = vsel %vm1728_vm8, %v1725_v23, %v3285_v44 }
 0x187   : > { %v1775_v51 = vpack.c.bf16 %v1758_v54, %v1757_v35 }
 0x189   : > { %2622 = vmatprep.mubr.msk.bf16.mxu1 %vm1797_vm9, %v1775_v51 }
 0x18a   : > { %2623 = vmatmul.mubr.msk.bf16.gmra.mxu1 %vm1797_vm9, %v1776_v25 }
 0x1d6   : > { %v2596_v28 = vpop.f32.mrf.mxu0 }
 0x1d7   : > { %v2082_v3 = vmul.f32 %v2596_v28, %v2596_v28  ;;  %v2014_v2 = vsel %vm1530_vm2, %v2596_v28, 0.0 }
 0x1d8   : > { %v1884_v52 = vpop.f32.mrf.mxu0 }
 0x1d9   : > { %v2080_v34 = vmul.f32 %v1884_v52, %v1884_v52  ;;  %v2011_v33 = vsel %vm1530_vm2, %v1884_v52, 0.0  ;;  %v2115_v55 = vsel %vm1530_vm2, %v2082_v3, 0.0 }
 0x1da   : > { %v2597_v11 = vpop.f32.mrf.mxu0 }
 0x1db   : > { %v2112_v12 = vsel %vm1530_vm2, %v2080_v34, 0.0  ;;  %v2083_v40 = vmul.f32 %v2597_v11, %v2597_v11  ;;  %v2016_v9 = vsel %vm1530_vm2, %v2597_v11, 0.0 }
 0x1dc   : > { %v1887_v56 = vpop.f32.mrf.mxu0 }
 0x1dd   : > { %v2081_v6 = vmul.f32 %v1887_v56, %v1887_v56  ;;  %v2012_v15 = vsel %vm1530_vm2, %v1887_v56, 0.0  ;;  %v2117_v57 = vsel %vm1530_vm2, %v2083_v40, 0.0 }
 0x1de   : > { %v2013_v61 = vadd.f32 %v2012_v15, %v2011_v33 }
 0x1df   : > { %v2113_v1 = vsel %vm1530_vm2, %v2081_v6, 0.0 }
 0x1e0   : > { %v2114_v30 = vadd.f32 %v2113_v1, %v2112_v12  ;;  %v2015_v31 = vadd.f32 %v2014_v2, %v2013_v61 }
 0x1e2   : > { %v2116_v63 = vadd.f32 %v2115_v55, %v2114_v30  ;;  %v2017_v47 = vadd.f32 %v2016_v9, %v2015_v31 }
 0x1e4   : > { %v2118_v32 = vadd.f32 %v2117_v57, %v2116_v63 }
 0x1e6   : > { %v4579_v45 = vpop.f32.mrf.mxu0 }
 0x1e7   : > { %v2086_v59 = vmul.f32 %v4579_v45, %v4579_v45  ;;  %v2022_v58 = vsel %vm1530_vm2, %v4579_v45, 0.0 }
 0x1e8   : > { %v4581_v60 = vpop.f32.mrf.mxu0 }
 0x1e9   : > { %v2084_v24 = vmul.f32 %v4581_v60, %v4581_v60  ;;  %v2018_v19 = vsel %vm1530_vm2, %v4581_v60, 0.0  ;;  %v2123_v37 = vsel %vm1530_vm2, %v2086_v59, 0.0 }
 0x1ea   : > { %v4586_v29 = vpop.f32.mrf.mxu0  ;;  %v2019_v48 = vadd.f32 %v2018_v19, %v2017_v47 }
 0x1eb   : > { %v2119_v8 = vsel %vm1530_vm2, %v2084_v24, 0.0  ;;  %v2087_v17 = vmul.f32 %v4586_v29, %v4586_v29  ;;  %v2024_v7 = vsel %vm1530_vm2, %v4586_v29, 0.0 }
 0x1ec   : > { %v4596_v18 = vpop.f32.mrf.mxu0  ;;  %v2120_v10 = vadd.f32 %v2119_v8, %v2118_v32 }
 0x1ed   : > { %v2085_v5 = vmul.f32 %v4596_v18, %v4596_v18  ;;  %v2020_v21 = vsel %vm1530_vm2, %v4596_v18, 0.0  ;;  %v2125_v41 = vsel %vm1530_vm2, %v2087_v17, 0.0 }
 0x1ee   : > { %v2021_v39 = vadd.f32 %v2020_v21, %v2019_v48 }
 0x1ef   : > { %v2121_v62 = vsel %vm1530_vm2, %v2085_v5, 0.0 }
 0x1f0   : > { %v2122_v20 = vadd.f32 %v2121_v62, %v2120_v10  ;;  %v2023_v49 = vadd.f32 %v2022_v58, %v2021_v39 }
 0x1f2   : > { %v2124_v44 = vadd.f32 %v2123_v37, %v2122_v20  ;;  %v2025_v26 = vadd.f32 %v2024_v7, %v2023_v49 }
 0x1f4   : > { %v2126_v51 = vadd.f32 %v2125_v41, %v2124_v44 }
 0x204   : > { %v4601_v4 = vpop.f32.mrf.mxu0 }
 0x205   : > { %v4584_v38 = vpop.f32.mrf.mxu1  ;;  %v2030_v34 = vsel %vm1530_vm2, %v4601_v4, 0.0 }
 0x206   : > { %v4612_v0 = vpop.f32.mrf.mxu0  ;;  %v3295_v27 = vpack.i.bf16 %v4584_v38, %v2596_v28  ;;  %v2098_v41 = vmul.f32 %v4584_v38, %v4584_v38 }
 0x207   : > { %v4590_v36 = vpop.f32.mrf.mxu1  ;;  %v2088_v50 = vmul.f32 %v4612_v0, %v4612_v0  ;;  %v2026_v53 = vsel %vm1530_vm2, %v4612_v0, 0.0 }
 0x208   : > { %v3291_v22 = vpack.i.bf16 %v4590_v36, %v1884_v52  ;;  %v4620_v46 = vpop.f32.mrf.mxu0  ;;  %v2027_v54 = vadd.f32 %v2026_v53, %v2025_v26  ;;  %v2096_v58 = vmul.f32 %v4590_v36, %v4590_v36  ;;  %v2042_v44 = vsel %vm1530_vm2, %v4590_v36, 0.0 }
 0x209   : > { %v4594_v13 = vpop.f32.mrf.mxu1  ;;  %v2127_v25 = vsel %vm1530_vm2, %v2088_v50, 0.0  ;;  %v2091_v61 = vmul.f32 %v4620_v46, %v4620_v46  ;;  %v2032_v30 = vsel %vm1530_vm2, %v4620_v46, 0.0 }
 0x20a   : > { %3292 = vxpose.xlu0.b32.start [1/16] (narrow) %v3291_v22, 8  ;;  %v3297_v16 = vpack.i.bf16 %v4594_v13, %v2597_v11  ;;  %v4627_v14 = vpop.f32.mrf.mxu0  ;;  %v2128_v52 = vadd.f32 %v2127_v25, %v2126_v51  ;;  %v2143_v25 = vsel %vm1530_vm2, %v2096_v58, 0.0  ;;  %v2046_v51 = vsel %vm1530_vm2, %v4584_v38, 0.0 }
 0x20b   : > { %v4599_v43 = vpop.f32.mrf.mxu1  ;;  %v2089_v23 = vmul.f32 %v4627_v14, %v4627_v14  ;;  %v2028_v35 = vsel %vm1530_vm2, %v4627_v14, 0.0 }
 0x20c   : > { %v3293_v42 = vpack.i.bf16 %v4599_v43, %v1887_v56  ;;  %v2029_v11 = vadd.f32 %v2028_v35, %v2027_v54  ;;  %v2090_v56 = vmul.f32 %v4601_v4, %v4601_v4  ;;  %v2097_v7 = vmul.f32 %v4599_v43, %v4599_v43 }
 0x20d   : > { %v2129_v28 = vsel %vm1530_vm2, %v2089_v23, 0.0  ;;  %v2044_v35 = vsel %vm1530_vm2, %v4599_v43, 0.0  ;;  %v2048_v43 = vsel %vm1530_vm2, %v4594_v13, 0.0 }
 0x20e   : > { %3294 = vxpose.xlu0.b32.cont [2/16] (narrow) %v3293_v42, 8  ;;  %v2130_v6 = vadd.f32 %v2129_v28, %v2128_v52  ;;  %v2031_v15 = vadd.f32 %v2030_v34, %v2029_v11  ;;  %v2131_v1 = vsel %vm1530_vm2, %v2090_v56, 0.0  ;;  %v2133_v42 = vsel %vm1530_vm2, %v2091_v61, 0.0 }
 0x20f   : > { %v2145_v28 = vsel %vm1530_vm2, %v2097_v7, 0.0  ;;  %v2147_v34 = vsel %vm1530_vm2, %v2098_v41, 0.0 }
 0x210   : > { %v2132_v12 = vadd.f32 %v2131_v1, %v2130_v6  ;;  %v2033_v40 = vadd.f32 %v2032_v30, %v2031_v15 }
 0x212   : > { %3296 = vxpose.xlu0.b32.cont [3/16] (narrow) %v3295_v27, 8  ;;  %v2134_v47 = vadd.f32 %v2133_v42, %v2132_v12 }
 0x216   : > { %3298 = vxpose.xlu0.b32.cont [4/16] (narrow) %v3297_v16, 8 }
 0x224   : > { %v4649_v33 = vpop.f32.mrf.mxu0 }
 0x225   : > { %v4654_v3 = vpop.f32.mrf.mxu1  ;;  %v2094_v8 = vmul.f32 %v4649_v33, %v4649_v33 }
 0x226   : > { %v4656_v22 = vpop.f32.mrf.mxu0 }
 0x227   : > { %v2034_v2 = vsel %vm1530_vm2, %v4656_v22, 0.0  ;;  %v2092_v31 = vmul.f32 %v4656_v22, %v4656_v22  ;;  %v1964_v55 = vpop.f32.mrf.mxu1  ;;  %v2139_v49 = vsel %vm1530_vm2, %v2094_v8, 0.0 }
 0x228   : > { %v4664_v24 = vpop.f32.mrf.mxu0  ;;  %v3299_v9 = vpack.i.bf16 %v1964_v55, %v4581_v60  ;;  %v2035_v5 = vadd.f32 %v2034_v2, %v2033_v40  ;;  %v2038_v60 = vsel %vm1530_vm2, %v4649_v33, 0.0  ;;  %v2100_v15 = vmul.f32 %v1964_v55, %v1964_v55 }
 0x229   : > { %v2135_v63 = vsel %vm1530_vm2, %v2092_v31, 0.0  ;;  %v4669_v19 = vpop.f32.mrf.mxu1  ;;  %v2095_v10 = vmul.f32 %v4664_v24, %v4664_v24  ;;  %v2040_v37 = vsel %vm1530_vm2, %v4664_v24, 0.0  ;;  %v2050_v30 = vsel %vm1530_vm2, %v1964_v55, 0.0 }
 0x22a   : > { %v4671_v57 = vpop.f32.mrf.mxu0  ;;  %3300 = vxpose.xlu0.b32.cont [5/16] (narrow) %v3299_v9, 8  ;;  %v2136_v32 = vadd.f32 %v2135_v63, %v2134_v47  ;;  %v3305_v52 = vpack.i.bf16 %v4669_v19, %v4586_v29  ;;  %v2102_v63 = vmul.f32 %v4654_v3, %v4654_v3  ;;  %v2054_v55 = vsel %vm1530_vm2, %v4654_v3, 0.0 }
 0x22b   : > { %v2036_v21 = vsel %vm1530_vm2, %v4671_v57, 0.0  ;;  %v2093_v27 = vmul.f32 %v4671_v57, %v4671_v57  ;;  %v1967_v48 = vpop.f32.mrf.mxu1  ;;  %v2141_v53 = vsel %vm1530_vm2, %v2095_v10, 0.0 }
 0x22c   : > { %v2037_v62 = vadd.f32 %v2036_v21, %v2035_v5  ;;  %v3301_v59 = vpack.i.bf16 %v1967_v48, %v4596_v18  ;;  %v3303_v18 = vpack.i.bf16 %v4654_v3, %v4579_v45  ;;  %v2099_v45 = vmul.f32 %v4594_v13, %v4594_v13 }
 0x22d   : > { %v2137_v39 = vsel %vm1530_vm2, %v2093_v27, 0.0  ;;  %v2101_v2 = vmul.f32 %v1967_v48, %v1967_v48  ;;  %v2151_v13 = vsel %vm1530_vm2, %v2100_v15, 0.0  ;;  %v2052_v9 = vsel %vm1530_vm2, %v1967_v48, 0.0 }
 0x22e   : > { %v2039_v16 = vadd.f32 %v2038_v60, %v2037_v62  ;;  %v2138_v20 = vadd.f32 %v2137_v39, %v2136_v32  ;;  %3302 = vxpose.xlu0.b32.cont [6/16] (narrow) %v3301_v59, 8  ;;  %v2149_v12 = vsel %vm1530_vm2, %v2099_v45, 0.0  ;;  %v2155_v60 = vsel %vm1530_vm2, %v2102_v63, 0.0 }
 0x22f   : > { %v2153_v21 = vsel %vm1530_vm2, %v2101_v2, 0.0  ;;  %v2056_v48 = vsel %vm1530_vm2, %v4669_v19, 0.0 }
 0x230   : > { %v2041_v17 = vadd.f32 %v2040_v37, %v2039_v16  ;;  %v2140_v50 = vadd.f32 %v2139_v49, %v2138_v20 }
 0x232   : > { %v2043_v23 = vadd.f32 %v2042_v44, %v2041_v17  ;;  %v2142_v26 = vadd.f32 %v2141_v53, %v2140_v50  ;;  %3304 = vxpose.xlu0.b32.cont [7/16] (narrow) %v3303_v18, 8 }
 0x234   : > { %v2045_v36 = vadd.f32 %v2044_v35, %v2043_v23  ;;  %v2144_v54 = vadd.f32 %v2143_v25, %v2142_v26 }
 0x236   : > { %v2146_v11 = vadd.f32 %v2145_v28, %v2144_v54  ;;  %v2047_v56 = vadd.f32 %v2046_v51, %v2045_v36  ;;  %v2620_v6 = vpop.f32.mrf.mxu1  ;;  %3306 = vxpose.xlu0.b32.cont [8/16] (narrow) %v3305_v52, 8 }
 0x237   : > { %v3311_v16 = vpack.i.bf16 %v2620_v6, %v4601_v4  ;;  %v2106_v7 = vmul.f32 %v2620_v6, %v2620_v6  ;;  %v2062_v4 = vsel %vm1530_vm2, %v2620_v6, 0.0 }
 0x238   : > { %v2049_v1 = vadd.f32 %v2048_v43, %v2047_v56  ;;  %v2148_v38 = vadd.f32 %v2147_v34, %v2146_v11  ;;  %v1980_v61 = vpop.f32.mrf.mxu1 }
 0x239   : > { %v3307_v29 = vpack.i.bf16 %v1980_v61, %v4612_v0  ;;  %v2103_v0 = vmul.f32 %v4669_v19, %v4669_v19  ;;  %v2104_v10 = vmul.f32 %v1980_v61, %v1980_v61  ;;  %v2058_v20 = vsel %vm1530_vm2, %v1980_v61, 0.0 }
 0x23a   : > { %v2051_v31 = vadd.f32 %v2050_v30, %v2049_v1  ;;  %v2150_v40 = vadd.f32 %v2149_v12, %v2148_v38  ;;  %v2621_v42 = vpop.f32.mrf.mxu1  ;;  %v2163_v41 = vsel %vm1530_vm2, %v2106_v7, 0.0 }
 0x23b   : > { %3308 = vxpose.xlu0.b32.cont [9/16] (narrow) %v3307_v29, 8  ;;  %v2157_v3 = vsel %vm1530_vm2, %v2103_v0, 0.0  ;;  %v3313_v50 = vpack.i.bf16 %v2621_v42, %v4620_v46  ;;  %v2107_v25 = vmul.f32 %v2621_v42, %v2621_v42  ;;  %v2064_v54 = vsel %vm1530_vm2, %v2621_v42, 0.0 }
 0x23c   : > { %v2053_v5 = vadd.f32 %v2052_v9, %v2051_v31  ;;  %v2152_v47 = vadd.f32 %v2151_v13, %v2150_v40  ;;  %v1983_v8 = vpop.f32.mrf.mxu1 }
 0x23d   : > { %v3309_v27 = vpack.i.bf16 %v1983_v8, %v4627_v14  ;;  %v2159_v14 = vsel %vm1530_vm2, %v2104_v10, 0.0  ;;  %v2105_v37 = vmul.f32 %v1983_v8, %v1983_v8  ;;  %v2060_v19 = vsel %vm1530_vm2, %v1983_v8, 0.0 }
 0x23e   : > { %v2055_v32 = vadd.f32 %v2054_v55, %v2053_v5  ;;  %v2154_v62 = vadd.f32 %v2153_v21, %v2152_v47  ;;  %v2165_v11 = vsel %vm1530_vm2, %v2107_v25, 0.0 }
 0x23f   : > { %3310 = vxpose.xlu0.b32.cont [10/16] (narrow) %v3309_v27, 8  ;;  %v2161_v18 = vsel %vm1530_vm2, %v2105_v37, 0.0 }
 0x240   : > { %v2156_v39 = vadd.f32 %v2155_v60, %v2154_v62  ;;  %v2057_v59 = vadd.f32 %v2056_v48, %v2055_v32 }
 0x242   : > { %v2059_v58 = vadd.f32 %v2058_v20, %v2057_v59  ;;  %v2158_v49 = vadd.f32 %v2157_v3, %v2156_v39 }
 0x243   : > { %3312 = vxpose.xlu0.b32.cont [11/16] (narrow) %v3311_v16, 8 }
 0x244   : > { %v2160_v17 = vadd.f32 %v2159_v14, %v2158_v49  ;;  %v2061_v44 = vadd.f32 %v2060_v19, %v2059_v58 }
 0x246   : > { %v2162_v53 = vadd.f32 %v2161_v18, %v2160_v17  ;;  %v2063_v23 = vadd.f32 %v2062_v4, %v2061_v44 }
 0x247   : > { %3314 = vxpose.xlu0.b32.cont [12/16] (narrow) %v3313_v50, 8 }
 0x248   : > { %v2164_v35 = vadd.f32 %v2163_v41, %v2162_v53  ;;  %v2065_v28 = vadd.f32 %v2064_v54, %v2063_v23 }
 0x24a   : > { %v2624_v26 = vpop.f32.mrf.mxu1  ;;  %v2166_v34 = vadd.f32 %v2165_v11, %v2164_v35 }
 0x24b   : > { %v2110_v15 = vmul.f32 %v2624_v26, %v2624_v26  ;;  %v3319_v63 = vpack.i.bf16 %v2624_v26, %v4649_v33 }
 0x24c   : > { %v1996_v36 = vpop.f32.mrf.mxu1 }
 0x24d   : > { %v2066_v46 = vsel %vm1530_vm2, %v1996_v36, 0.0  ;;  %v2108_v51 = vmul.f32 %v1996_v36, %v1996_v36  ;;  %v3315_v45 = vpack.i.bf16 %v1996_v36, %v4656_v22  ;;  %v2070_v22 = vsel %vm1530_vm2, %v2624_v26, 0.0 }
 0x24e   : > { %v2625_v52 = vpop.f32.mrf.mxu1  ;;  %v2067_v6 = vadd.f32 %v2066_v46, %v2065_v28  ;;  %v2171_v42 = vsel %vm1530_vm2, %v2110_v15, 0.0 }
 0x24f   : > { %v2167_v56 = vsel %vm1530_vm2, %v2108_v51, 0.0  ;;  %3316 = vxpose.xlu0.b32.cont [13/16] (narrow) %v3315_v45, 8  ;;  %v2111_v2 = vmul.f32 %v2625_v52, %v2625_v52  ;;  %v2072_v13 = vsel %vm1530_vm2, %v2625_v52, 0.0  ;;  %v3321_v55 = vpack.i.bf16 %v2625_v52, %v4664_v24 }
 0x250   : > { %v1999_v43 = vpop.f32.mrf.mxu1  ;;  %v2168_v12 = vadd.f32 %v2167_v56, %v2166_v34 }
 0x251   : > { %v2068_v1 = vsel %vm1530_vm2, %v1999_v43, 0.0  ;;  %v2109_v38 = vmul.f32 %v1999_v43, %v1999_v43  ;;  %v3317_v61 = vpack.i.bf16 %v1999_v43, %v4671_v57  ;;  %v2173_v57 = vsel %vm1530_vm2, %v2111_v2, 0.0 }
 0x252   : > { %v2069_v30 = vadd.f32 %v2068_v1, %v2067_v6 }
 0x253   : > { %v2169_v29 = vsel %vm1530_vm2, %v2109_v38, 0.0  ;;  %3318 = vxpose.xlu0.b32.cont [14/16] (narrow) %v3317_v61, 8 }
 0x254   : > { %v2071_v31 = vadd.f32 %v2070_v22, %v2069_v30  ;;  %v2170_v40 = vadd.f32 %v2169_v29, %v2168_v12 }
 0x256   : > { %v2073_v9 = vadd.f32 %v2072_v13, %v2071_v31  ;;  %v2172_v5 = vadd.f32 %v2171_v42, %v2170_v40 }
 0x257   : > { %3320 = vxpose.xlu0.b32.cont [15/16] (narrow) %v3319_v63, 8 }
 0x258   : > { %v2074_v47 = vrot.slane %v2073_v9, 4  ;;  %v2174_v8 = vadd.f32 %v2173_v57, %v2172_v5 }
 0x25a   : > { %v2075_v0 = vadd.f32 %v2074_v47, %v2073_v9  ;;  %v2175_v21 = vrot.slane %v2174_v8, 4 }
 0x25b   : > { %3322 = vxpose.xlu0.b32.end [16/16] (narrow) %v3321_v55, 8 }
 0x25c   : > { %v2076_v27 = vrot.slane %v2075_v0, 2  ;;  %v2176_v32 = vadd.f32 %v2175_v21, %v2174_v8 }
 0x25e   : > { %v2077_v62 = vadd.f32 %v2076_v27, %v2075_v0  ;;  %v2177_v33 = vrot.slane %v2176_v32, 2 }
 0x260   : > { %v2078_v60 = vrot.slane %v2077_v62, 1  ;;  %v2178_v48 = vadd.f32 %v2177_v33, %v2176_v32 }
 0x262   : > { %v2179_v10 = vrot.slane %v2178_v48, 1  ;;  %v2079_v39 = vadd.f32 %v2078_v60, %v2077_v62 }
 0x264   : > { %v2180_v24 = vadd.f32 %v2179_v10, %v2178_v48 }
 0x266   : > { %v2182_v59 = vsel %vm2181_vm10, %v2079_v39, %v2180_v24 }
 0x267   : > { %2184 = vst.msk [vmem:[%s181_s8] sm:$0x3] %vm2183_vm11, %v2182_v59 }
 0x29b   : > { %v3323_v3 = vpop.trf.xlu0 }
 0x29c   : > { %v3327_v16 = vunpack.i.h.bf16 %v3323_v3  ;;  %v3324_v20 = vunpack.i.l.bf16 %v3323_v3 }
 0x29e   : > { %v2568_v58 = vpack.c.bf16 %v3327_v16, %v3324_v20 }
 0x2a0   : > { %2257 = vst [vmem:[%s177_s14] sm:$0xff] %v2568_v58 }
 0x2a1 PF: > { %s14_s12 = sadd.s32 1, %s3343_s12  }
 0x2a2   : > { %p11_p4 = scmp.ge.s32.totalorder %s14_s12, 4  }
 0x2a4   :  { %13 = sbr.rel (!%p11_p4) target bundleno = 1 (0x1), region = 72 }

</bundles_post_ra>
